<compile_context>
chip_gen: v7x
topology: tpu7x:2x2x1
jax: 0.10.0
libtpu: 0.0.40
codegen_flags: <defaults>
</compile_context>

<pallas_src>
import math
from functools import partial

import jax
import jax.numpy as jnp
from jax import lax
from jax.experimental import pallas as pl
from jax.experimental.pallas import tpu as pltpu

# ---- module hyper-parameters (consistent with the PyTorch module) ----
EMB_SIZE = 32
NUM_HEADS = 4
DFF = 64
NUM_TRANSMIT = 8
NUM_ENC_LAYERS = 2
HEAD_DIM = EMB_SIZE // NUM_HEADS
LN_EPS = 1e-5

# packed per-layer parameter slabs
W_SLAB = 3 * EMB_SIZE + EMB_SIZE + DFF   # [Wqkv(q-scaled) | Wo | W1] along lanes = 192
V_ROWS = 8                               # one bias / LayerNorm vector per sublane row
V_LANES = 128


def _layernorm(x, gamma, beta):
    # PyTorch LayerNorm: biased variance over last dim.
    mean = jnp.mean(x, axis=-1, keepdims=True)
    var = jnp.mean((x - mean) ** 2, axis=-1, keepdims=True)
    return (x - mean) * lax.rsqrt(var + LN_EPS) * gamma + beta


def fused_encoder_kernel(x_ref, pos_ref, w_ref, w2_ref, vec_ref, o_ref):
    """One grid step = one batch block; ALL encoder layers run inside (unrolled)."""
    E, H, Dh = EMB_SIZE, NUM_HEADS, HEAD_DIM
    Bb, S, _ = x_ref.shape
    M = Bb * S          # all rows of this batch block feed each MXU matmul
    G = H * Bb          # batched-attention batch axis (head-major, batch-minor)
    L = w_ref.shape[0]  # number of encoder layers (static)

    # fused positional-embedding add; activation stays on-chip for all layers.
    x = (x_ref[...] + pos_ref[...]).reshape(M, E)

    for l in range(L):  # static unroll over NUM_ENC_LAYERS
        # ---- packed per-layer bias / LayerNorm vectors (one sublane row each) ----
        vec = vec_ref[l]                       # (8, 128)
        bqkv = vec[0:1, 0:3 * E]               # (1, 3E) (Q part pre-scaled)
        bo   = vec[1:2, 0:E]
        ln1g = vec[2:3, 0:E]
        ln1b = vec[3:4, 0:E]
        b1   = vec[4:5, 0:DFF]
        b2   = vec[5:6, 0:E]
        ln2g = vec[6:7, 0:E]
        ln2b = vec[7:8, 0:E]

        # ---- packed per-layer weights: [Wqkv | Wo | W1] slab + untransposed W2 ----
        w = w_ref[l]                           # (E, W_SLAB)
        wqkv = w[:, 0:3 * E]                   # (E, 3E)  1/sqrt(Dh) folded into Q cols
        wo   = w[:, 3 * E:4 * E]               # (E, E)
        w1   = w[:, 4 * E:4 * E + DFF]         # (E, DFF)
        w2   = w2_ref[l]                       # (DFF, E) -> MXU-direct, no transpose

        # ---- multi-head self-attention: all heads via batched contractions ----
        qkv = jnp.dot(x, wqkv, preferred_element_type=jnp.float32) + bqkv   # (M, 3E)

        def split_heads(off):
            # (M, E) column range -> (H, Bb, S, Dh) -> (G, S, Dh).
            # Only lane slices, leading-axis stacking and leading-dim reshapes
            # (layout-cheap, no minor-dim relayout).
            return jnp.stack(
                [qkv[:, off + h * Dh: off + (h + 1) * Dh].reshape(Bb, S, Dh)
                 for h in range(H)],
                axis=0).reshape(G, S, Dh)

        q = split_heads(0)          # scale already folded into Wqkv / bqkv
        k = split_heads(E)
        v = split_heads(2 * E)

        # one scores contraction + one softmax for ALL heads
        sc = jnp.einsum('gqd,gkd->gqk', q, k,
                        preferred_element_type=jnp.float32)                 # (G, S, S)
        sc = sc - jnp.max(sc, axis=-1, keepdims=True)
        p = jnp.exp(sc)
        p = p / jnp.sum(p, axis=-1, keepdims=True)      # exact divide (PyTorch-faithful)

        # one PV contraction for all heads
        o = jnp.einsum('gqk,gkd->gqd', p, v,
                       preferred_element_type=jnp.float32)                  # (G, S, Dh)

        # fold the output projection per head; head reduction is a cheap leading-axis sum
        o = o.reshape(H, M, Dh)
        owo = jnp.einsum('hmd,hde->hme', o, wo.reshape(H, Dh, E),
                         preferred_element_type=jnp.float32)                # (H, M, E)
        attn = jnp.sum(owo, axis=0) + bo                                    # (M, E)

        # ---- residual + LayerNorm 1 (post-norm, norm_first=False) ----
        h1 = _layernorm(x + attn, ln1g, ln1b)

        # ---- ReLU feed-forward ----
        ff = jnp.maximum(jnp.dot(h1, w1, preferred_element_type=jnp.float32) + b1, 0.0)
        ff = jnp.dot(ff, w2, preferred_element_type=jnp.float32) + b2

        # ---- residual + LayerNorm 2; activation stays on-chip for the next layer ----
        x = _layernorm(h1 + ff, ln2g, ln2b)

    o_ref[...] = x.reshape(Bb, S, E).astype(o_ref.dtype)


@partial(jax.jit, static_argnames=("batch_block",))
def signal_att_forward(x, pos_embs, w_slab, w2_slab, vec_slab, batch_block=None):
    B, S, E = x.shape
    L = w_slab.shape[0]
    # Default: whole batch in a single block / single grid step (minimal per-step
    # overhead on 1-TC chips).  For v7x megacore or very large B, pass
    # batch_block = B // n_blocks (a multiple of 8) so the "parallel" batch axis
    # has >=2 blocks and each block stays under the scoped VMEM limit.
    Bb = B if batch_block is None else batch_block
    assert B % Bb == 0
    return pl.pallas_call(
        fused_encoder_kernel,
        out_shape=jax.ShapeDtypeStruct((B, S, E), x.dtype),
        grid_spec=pltpu.PrefetchScalarGridSpec(
            num_scalar_prefetch=0,
            grid=(B // Bb,),
            in_specs=[
                pl.BlockSpec((Bb, S, E), lambda b: (b, 0, 0)),            # x
                pl.BlockSpec((1, S, E), lambda b: (0, 0, 0)),             # pos_embs
                pl.BlockSpec((L, E, W_SLAB), lambda b: (0, 0, 0)),        # [Wqkv|Wo|W1]
                pl.BlockSpec((L, DFF, E), lambda b: (0, 0, 0)),           # W2 (untransposed)
                pl.BlockSpec((L, V_ROWS, V_LANES), lambda b: (0, 0, 0)),  # biases / LN
            ],
            out_specs=pl.BlockSpec((Bb, S, E), lambda b: (b, 0, 0)),
        ),
        compiler_params=pltpu.CompilerParams(
            dimension_semantics=("parallel",)),
        input_output_aliases={0: 0},   # reuse x's HBM buffer for the output
    )(x, pos_embs, w_slab, w2_slab, vec_slab)


def init_params(key):
    """Deterministic synthetic parameters (shapes match nn.TransformerEncoderLayer)."""
    keys = jax.random.split(key, 1 + NUM_ENC_LAYERS)
    pos_embs = jax.random.normal(keys[0], (1, NUM_TRANSMIT, EMB_SIZE), jnp.float32)
    layers = []
    for l in range(NUM_ENC_LAYERS):
        ks = jax.random.split(keys[1 + l], 6)
        s = 0.05
        wqkv = s * jax.random.normal(ks[0], (EMB_SIZE, 3 * EMB_SIZE), jnp.float32)
        bqkv = jnp.zeros((1, 3 * EMB_SIZE), jnp.float32)
        wo = s * jax.random.normal(ks[1], (EMB_SIZE, EMB_SIZE), jnp.float32)
        bo = jnp.zeros((1, EMB_SIZE), jnp.float32)
        ln1g = jnp.ones((1, EMB_SIZE), jnp.float32)
        ln1b = jnp.zeros((1, EMB_SIZE), jnp.float32)
        w1 = s * jax.random.normal(ks[2], (EMB_SIZE, DFF), jnp.float32)
        b1 = s * jax.random.normal(ks[3], (1, DFF), jnp.float32)
        w2 = s * jax.random.normal(ks[4], (DFF, EMB_SIZE), jnp.float32)
        b2 = s * jax.random.normal(ks[5], (1, EMB_SIZE), jnp.float32)
        ln2g = jnp.ones((1, EMB_SIZE), jnp.float32)
        ln2b = jnp.zeros((1, EMB_SIZE), jnp.float32)
        layers.append((wqkv, bqkv, wo, bo, ln1g, ln1b,
                       w1, b1, w2, b2, ln2g, ln2b))
    return pos_embs, layers


def pack_params(layers):
    """Pack per-layer params: (L,E,192) weight slab, (L,DFF,E) W2 slab, (L,8,128) vectors.

    The 1/sqrt(HEAD_DIM) attention scale is folded into the Q columns of Wqkv
    and bqkv here (one-time transformation, not a per-call wrapper op).
    """
    scale = 1.0 / math.sqrt(HEAD_DIM)
    w_slabs, w2_slabs, v_slabs = [], [], []
    for (wqkv, bqkv, wo, bo, ln1g, ln1b, w1, b1, w2, b2, ln2g, ln2b) in layers:
        wqkv_s = wqkv.at[:, 0:EMB_SIZE].multiply(scale)
        bqkv_s = bqkv.at[:, 0:EMB_SIZE].multiply(scale)
        w_slabs.append(jnp.concatenate([wqkv_s, wo, w1], axis=1))    # (E, W_SLAB)
        w2_slabs.append(w2)                                          # (DFF, E) untransposed
        vec = jnp.zeros((V_ROWS, V_LANES), jnp.float32)
        for row, val in enumerate([bqkv_s, bo, ln1g, ln1b, b1, b2, ln2g, ln2b]):
            flat = val.reshape(-1)
            vec = vec.at[row, 0:flat.shape[0]].set(flat)
        v_slabs.append(vec)
    return jnp.stack(w_slabs), jnp.stack(w2_slabs), jnp.stack(v_slabs)


def reference_forward(x, pos_embs, layers):
    """Pure-JAX reference (eval-mode PyTorch semantics) for correctness check."""
    x = x + pos_embs
    B, S, E = x.shape
    for (wqkv, bqkv, wo, bo, ln1g, ln1b, w1, b1, w2, b2, ln2g, ln2b) in layers:
        xm = x.reshape(B * S, E)
        qkv = xm @ wqkv + bqkv
        q = qkv[:, 0:E].reshape(B, S, NUM_HEADS, HEAD_DIM).transpose(0, 2, 1, 3)
        k = qkv[:, E:2 * E].reshape(B, S, NUM_HEADS, HEAD_DIM).transpose(0, 2, 1, 3)
        v = qkv[:, 2 * E:3 * E].reshape(B, S, NUM_HEADS, HEAD_DIM).transpose(0, 2, 1, 3)
        sc = jnp.einsum('bhqd,bhkd->bhqk', q, k) / math.sqrt(HEAD_DIM)
        p = jax.nn.softmax(sc, axis=-1)
        o = jnp.einsum('bhqk,bhkd->bhqd', p, v).transpose(0, 2, 1, 3).reshape(B * S, E)
        attn = o @ wo + bo
        h1 = _layernorm(xm + attn, ln1g, ln1b)
        ff = jnp.maximum(h1 @ w1 + b1, 0.0) @ w2 + b2
        x = _layernorm(h1 + ff, ln2g, ln2b).reshape(B, S, E)
    return x


if __name__ == "__main__":
    key = jax.random.PRNGKey(0)
    k_x, k_p = jax.random.split(key)
    B = 2
    x = jax.random.normal(k_x, (B, NUM_TRANSMIT, EMB_SIZE), jnp.float32)
    pos_embs, layers = init_params(k_p)
    w_slab, w2_slab, vec_slab = pack_params(layers)

    out = signal_att_forward(x, pos_embs, w_slab, w2_slab, vec_slab)
    out = jax.block_until_ready(out)

    assert out.shape == (B, NUM_TRANSMIT, EMB_SIZE)
    assert bool(jnp.all(jnp.isfinite(out)))

    ref = reference_forward(x, pos_embs, layers)
    # exact softmax divide in the kernel -> tight tolerance vs. the reference
    assert bool(jnp.allclose(out, ref, rtol=1e-4, atol=1e-4))

    print("KERNEL_OK")
</pallas_src>

<mosaic_0001>
module attributes {stable_mosaic.version = 11 : i64} {
  func.func @fused_encoder_kernel(%arg0: i32, %arg1: memref<2x8x32xf32, #tpu.memory_space<vmem>>, %arg2: memref<1x8x32xf32, #tpu.memory_space<vmem>>, %arg3: memref<2x32x192xf32, #tpu.memory_space<vmem>>, %arg4: memref<2x64x32xf32, #tpu.memory_space<vmem>>, %arg5: memref<2x8x128xf32, #tpu.memory_space<vmem>>, %arg6: memref<2x8x32xf32, #tpu.memory_space<vmem>>) attributes {dimension_semantics = [#tpu.dimension_semantics<parallel>], iteration_bounds = array<i64: 1>, scalar_prefetch = 0 : i64, scratch_operands = 0 : i64, tpu.core_type = #tpu.core_type<tc>, window_params = [{transform_indices = @transform_0, window_bounds = array<i64: 2, 8, 32>}, {pipeline_mode = #tpu.pipeline_mode<synchronous>, transform_indices = @transform_1, window_bounds = array<i64: 1, 8, 32>}, {pipeline_mode = #tpu.pipeline_mode<synchronous>, transform_indices = @transform_2, window_bounds = array<i64: 2, 32, 192>}, {pipeline_mode = #tpu.pipeline_mode<synchronous>, transform_indices = @transform_3, window_bounds = array<i64: 2, 64, 32>}, {pipeline_mode = #tpu.pipeline_mode<synchronous>, transform_indices = @transform_4, window_bounds = array<i64: 2, 8, 128>}, {transform_indices = @transform_5, window_bounds = array<i64: 2, 8, 32>}]} {
    %c0 = arith.constant 0 : index
    %c0_0 = arith.constant 0 : index
    %c0_1 = arith.constant 0 : index
    %0 = vector.load %arg1[%c0, %c0_0, %c0_1] : memref<2x8x32xf32, #tpu.memory_space<vmem>>, vector<2x8x32xf32>
    %c0_2 = arith.constant 0 : index
    %c0_3 = arith.constant 0 : index
    %c0_4 = arith.constant 0 : index
    %1 = vector.load %arg2[%c0_2, %c0_3, %c0_4] : memref<1x8x32xf32, #tpu.memory_space<vmem>>, vector<1x8x32xf32>
    %2 = vector.broadcast %1 : vector<1x8x32xf32> to vector<2x8x32xf32>
    %3 = arith.addf %0, %2 : vector<2x8x32xf32>
    %4 = vector.shape_cast %3 : vector<2x8x32xf32> to vector<16x32xf32>
    %c0_5 = arith.constant 0 : index
    %c0_6 = arith.constant 0 : index
    %c0_7 = arith.constant 0 : index
    %5 = vector.load %arg5[%c0_5, %c0_6, %c0_7] : memref<2x8x128xf32, #tpu.memory_space<vmem>>, vector<1x8x128xf32>
    %6 = vector.shape_cast %5 : vector<1x8x128xf32> to vector<8x128xf32>
    %7 = vector.extract_strided_slice %6 {offsets = [0, 0], sizes = [1, 96], strides = [1, 1]} : vector<8x128xf32> to vector<1x96xf32>
    %8 = vector.extract_strided_slice %6 {offsets = [1, 0], sizes = [1, 32], strides = [1, 1]} : vector<8x128xf32> to vector<1x32xf32>
    %9 = vector.extract_strided_slice %6 {offsets = [2, 0], sizes = [1, 32], strides = [1, 1]} : vector<8x128xf32> to vector<1x32xf32>
    %10 = vector.extract_strided_slice %6 {offsets = [3, 0], sizes = [1, 32], strides = [1, 1]} : vector<8x128xf32> to vector<1x32xf32>
    %11 = vector.extract_strided_slice %6 {offsets = [4, 0], sizes = [1, 64], strides = [1, 1]} : vector<8x128xf32> to vector<1x64xf32>
    %12 = vector.extract_strided_slice %6 {offsets = [5, 0], sizes = [1, 32], strides = [1, 1]} : vector<8x128xf32> to vector<1x32xf32>
    %13 = vector.extract_strided_slice %6 {offsets = [6, 0], sizes = [1, 32], strides = [1, 1]} : vector<8x128xf32> to vector<1x32xf32>
    %14 = vector.extract_strided_slice %6 {offsets = [7, 0], sizes = [1, 32], strides = [1, 1]} : vector<8x128xf32> to vector<1x32xf32>
    %c0_8 = arith.constant 0 : index
    %c0_9 = arith.constant 0 : index
    %c0_10 = arith.constant 0 : index
    %15 = vector.load %arg3[%c0_8, %c0_9, %c0_10] : memref<2x32x192xf32, #tpu.memory_space<vmem>>, vector<1x32x192xf32>
    %16 = vector.shape_cast %15 : vector<1x32x192xf32> to vector<32x192xf32>
    %17 = vector.extract_strided_slice %16 {offsets = [0, 0], sizes = [32, 96], strides = [1, 1]} : vector<32x192xf32> to vector<32x96xf32>
    %18 = vector.extract_strided_slice %16 {offsets = [0, 96], sizes = [32, 32], strides = [1, 1]} : vector<32x192xf32> to vector<32x32xf32>
    %19 = vector.extract_strided_slice %16 {offsets = [0, 128], sizes = [32, 64], strides = [1, 1]} : vector<32x192xf32> to vector<32x64xf32>
    %c0_11 = arith.constant 0 : index
    %c0_12 = arith.constant 0 : index
    %c0_13 = arith.constant 0 : index
    %20 = vector.load %arg4[%c0_11, %c0_12, %c0_13] : memref<2x64x32xf32, #tpu.memory_space<vmem>>, vector<1x64x32xf32>
    %21 = vector.shape_cast %20 : vector<1x64x32xf32> to vector<64x32xf32>
    %cst = arith.constant dense<0.000000e+00> : vector<16x96xf32>
    %22 = tpu.matmul %4, %17, %cst {dimension_numbers = #tpu.dot_dimension_numbers<[1], [0], [0], [1], [0, 0, 1, 1], [], []>} : vector<16x32xf32>, vector<32x96xf32>, vector<16x96xf32> -> vector<16x96xf32>
    %23 = vector.broadcast %7 : vector<1x96xf32> to vector<16x96xf32>
    %24 = arith.addf %22, %23 : vector<16x96xf32>
    %25 = vector.extract_strided_slice %24 {offsets = [0, 0], sizes = [16, 8], strides = [1, 1]} : vector<16x96xf32> to vector<16x8xf32>
    %26 = vector.shape_cast %25 : vector<16x8xf32> to vector<2x8x8xf32>
    %27 = vector.extract_strided_slice %24 {offsets = [0, 8], sizes = [16, 8], strides = [1, 1]} : vector<16x96xf32> to vector<16x8xf32>
    %28 = vector.shape_cast %27 : vector<16x8xf32> to vector<2x8x8xf32>
    %29 = vector.extract_strided_slice %24 {offsets = [0, 16], sizes = [16, 8], strides = [1, 1]} : vector<16x96xf32> to vector<16x8xf32>
    %30 = vector.shape_cast %29 : vector<16x8xf32> to vector<2x8x8xf32>
    %31 = vector.extract_strided_slice %24 {offsets = [0, 24], sizes = [16, 8], strides = [1, 1]} : vector<16x96xf32> to vector<16x8xf32>
    %32 = vector.shape_cast %31 : vector<16x8xf32> to vector<2x8x8xf32>
    %33 = vector.shape_cast %26 : vector<2x8x8xf32> to vector<1x2x8x8xf32>
    %34 = vector.shape_cast %28 : vector<2x8x8xf32> to vector<1x2x8x8xf32>
    %35 = vector.shape_cast %30 : vector<2x8x8xf32> to vector<1x2x8x8xf32>
    %36 = vector.shape_cast %32 : vector<2x8x8xf32> to vector<1x2x8x8xf32>
    %37 = tpu.concatenate %33, %34, %35, %36 in 0 : vector<1x2x8x8xf32>, vector<1x2x8x8xf32>, vector<1x2x8x8xf32>, vector<1x2x8x8xf32> -> vector<4x2x8x8xf32>
    %38 = vector.shape_cast %37 : vector<4x2x8x8xf32> to vector<8x8x8xf32>
    %39 = vector.extract_strided_slice %24 {offsets = [0, 32], sizes = [16, 8], strides = [1, 1]} : vector<16x96xf32> to vector<16x8xf32>
    %40 = vector.shape_cast %39 : vector<16x8xf32> to vector<2x8x8xf32>
    %41 = vector.extract_strided_slice %24 {offsets = [0, 40], sizes = [16, 8], strides = [1, 1]} : vector<16x96xf32> to vector<16x8xf32>
    %42 = vector.shape_cast %41 : vector<16x8xf32> to vector<2x8x8xf32>
    %43 = vector.extract_strided_slice %24 {offsets = [0, 48], sizes = [16, 8], strides = [1, 1]} : vector<16x96xf32> to vector<16x8xf32>
    %44 = vector.shape_cast %43 : vector<16x8xf32> to vector<2x8x8xf32>
    %45 = vector.extract_strided_slice %24 {offsets = [0, 56], sizes = [16, 8], strides = [1, 1]} : vector<16x96xf32> to vector<16x8xf32>
    %46 = vector.shape_cast %45 : vector<16x8xf32> to vector<2x8x8xf32>
    %47 = vector.shape_cast %40 : vector<2x8x8xf32> to vector<1x2x8x8xf32>
    %48 = vector.shape_cast %42 : vector<2x8x8xf32> to vector<1x2x8x8xf32>
    %49 = vector.shape_cast %44 : vector<2x8x8xf32> to vector<1x2x8x8xf32>
    %50 = vector.shape_cast %46 : vector<2x8x8xf32> to vector<1x2x8x8xf32>
    %51 = tpu.concatenate %47, %48, %49, %50 in 0 : vector<1x2x8x8xf32>, vector<1x2x8x8xf32>, vector<1x2x8x8xf32>, vector<1x2x8x8xf32> -> vector<4x2x8x8xf32>
    %52 = vector.shape_cast %51 : vector<4x2x8x8xf32> to vector<8x8x8xf32>
    %53 = vector.extract_strided_slice %24 {offsets = [0, 64], sizes = [16, 8], strides = [1, 1]} : vector<16x96xf32> to vector<16x8xf32>
    %54 = vector.shape_cast %53 : vector<16x8xf32> to vector<2x8x8xf32>
    %55 = vector.extract_strided_slice %24 {offsets = [0, 72], sizes = [16, 8], strides = [1, 1]} : vector<16x96xf32> to vector<16x8xf32>
    %56 = vector.shape_cast %55 : vector<16x8xf32> to vector<2x8x8xf32>
    %57 = vector.extract_strided_slice %24 {offsets = [0, 80], sizes = [16, 8], strides = [1, 1]} : vector<16x96xf32> to vector<16x8xf32>
    %58 = vector.shape_cast %57 : vector<16x8xf32> to vector<2x8x8xf32>
    %59 = vector.extract_strided_slice %24 {offsets = [0, 88], sizes = [16, 8], strides = [1, 1]} : vector<16x96xf32> to vector<16x8xf32>
    %60 = vector.shape_cast %59 : vector<16x8xf32> to vector<2x8x8xf32>
    %61 = vector.shape_cast %54 : vector<2x8x8xf32> to vector<1x2x8x8xf32>
    %62 = vector.shape_cast %56 : vector<2x8x8xf32> to vector<1x2x8x8xf32>
    %63 = vector.shape_cast %58 : vector<2x8x8xf32> to vector<1x2x8x8xf32>
    %64 = vector.shape_cast %60 : vector<2x8x8xf32> to vector<1x2x8x8xf32>
    %65 = tpu.concatenate %61, %62, %63, %64 in 0 : vector<1x2x8x8xf32>, vector<1x2x8x8xf32>, vector<1x2x8x8xf32>, vector<1x2x8x8xf32> -> vector<4x2x8x8xf32>
    %66 = vector.shape_cast %65 : vector<4x2x8x8xf32> to vector<8x8x8xf32>
    "tpu.trace_start"() <{level = 10 : i32, message = "gqd,gkd->gqk"}> : () -> ()
    %cst_14 = arith.constant dense<0.000000e+00> : vector<8x8x8xf32>
    %67 = tpu.matmul %38, %52, %cst_14 {dimension_numbers = #tpu.dot_dimension_numbers<[2], [2], [1], [1], [0, 0, 0, 1, 1, 1], [0], [0]>} : vector<8x8x8xf32>, vector<8x8x8xf32>, vector<8x8x8xf32> -> vector<8x8x8xf32>
    "tpu.trace_stop"() : () -> ()
    %cst_15 = arith.constant dense<0xFF800000> : vector<8x8xf32>
    %68 = vector.multi_reduction <maximumf>, %67, %cst_15 [2] : vector<8x8x8xf32> to vector<8x8xf32>
    %69 = vector.shape_cast %68 : vector<8x8xf32> to vector<8x8x1xf32>
    %70 = vector.broadcast %69 : vector<8x8x1xf32> to vector<8x8x8xf32>
    %71 = arith.subf %67, %70 : vector<8x8x8xf32>
    %72 = math.exp %71 : vector<8x8x8xf32>
    %cst_16 = arith.constant dense<0.000000e+00> : vector<8x8xf32>
    %73 = vector.multi_reduction <add>, %72, %cst_16 [2] : vector<8x8x8xf32> to vector<8x8xf32>
    %74 = vector.shape_cast %73 : vector<8x8xf32> to vector<8x8x1xf32>
    %75 = vector.broadcast %74 : vector<8x8x1xf32> to vector<8x8x8xf32>
    %76 = arith.divf %72, %75 : vector<8x8x8xf32>
    "tpu.trace_start"() <{level = 10 : i32, message = "gqk,gkd->gqd"}> : () -> ()
    %cst_17 = arith.constant dense<0.000000e+00> : vector<8x8x8xf32>
    %77 = tpu.matmul %76, %66, %cst_17 {dimension_numbers = #tpu.dot_dimension_numbers<[2], [1], [1], [2], [0, 0, 0, 1, 1, 2], [0], [0]>} : vector<8x8x8xf32>, vector<8x8x8xf32>, vector<8x8x8xf32> -> vector<8x8x8xf32>
    "tpu.trace_stop"() : () -> ()
    %78 = vector.shape_cast %77 : vector<8x8x8xf32> to vector<4x16x8xf32>
    %79 = vector.shape_cast %18 : vector<32x32xf32> to vector<4x8x32xf32>
    "tpu.trace_start"() <{level = 10 : i32, message = "hmd,hde->hme"}> : () -> ()
    %cst_18 = arith.constant dense<0.000000e+00> : vector<4x16x32xf32>
    %80 = tpu.matmul %78, %79, %cst_18 {dimension_numbers = #tpu.dot_dimension_numbers<[2], [1], [1], [2], [0, 0, 0, 1, 1, 2], [0], [0]>} : vector<4x16x8xf32>, vector<4x8x32xf32>, vector<4x16x32xf32> -> vector<4x16x32xf32>
    "tpu.trace_stop"() : () -> ()
    %cst_19 = arith.constant dense<0.000000e+00> : vector<16x32xf32>
    %81 = vector.multi_reduction <add>, %80, %cst_19 [0] : vector<4x16x32xf32> to vector<16x32xf32>
    %82 = vector.broadcast %8 : vector<1x32xf32> to vector<16x32xf32>
    %83 = arith.addf %81, %82 : vector<16x32xf32>
    %84 = arith.addf %4, %83 : vector<16x32xf32>
    %cst_20 = arith.constant dense<0.000000e+00> : vector<16xf32>
    %85 = vector.multi_reduction <add>, %84, %cst_20 [1] : vector<16x32xf32> to vector<16xf32>
    %86 = vector.shape_cast %85 : vector<16xf32> to vector<16x1xf32>
    %cst_21 = arith.constant 3.200000e+01 : f32
    %87 = vector.broadcast %cst_21 : f32 to vector<16x1xf32>
    %88 = arith.divf %86, %87 : vector<16x1xf32>
    %89 = vector.broadcast %88 : vector<16x1xf32> to vector<16x32xf32>
    %90 = arith.subf %84, %89 : vector<16x32xf32>
    %91 = arith.mulf %90, %90 : vector<16x32xf32>
    %cst_22 = arith.constant dense<0.000000e+00> : vector<16xf32>
    %92 = vector.multi_reduction <add>, %91, %cst_22 [1] : vector<16x32xf32> to vector<16xf32>
    %93 = vector.shape_cast %92 : vector<16xf32> to vector<16x1xf32>
    %cst_23 = arith.constant 3.200000e+01 : f32
    %94 = vector.broadcast %cst_23 : f32 to vector<16x1xf32>
    %95 = arith.divf %93, %94 : vector<16x1xf32>
    %96 = vector.broadcast %88 : vector<16x1xf32> to vector<16x32xf32>
    %97 = arith.subf %84, %96 : vector<16x32xf32>
    %cst_24 = arith.constant 9.99999974E-6 : f32
    %98 = vector.broadcast %cst_24 : f32 to vector<16x1xf32>
    %99 = arith.addf %95, %98 : vector<16x1xf32>
    %100 = math.rsqrt %99 : vector<16x1xf32>
    %101 = vector.broadcast %100 : vector<16x1xf32> to vector<16x32xf32>
    %102 = arith.mulf %97, %101 : vector<16x32xf32>
    %103 = vector.broadcast %9 : vector<1x32xf32> to vector<16x32xf32>
    %104 = arith.mulf %102, %103 : vector<16x32xf32>
    %105 = vector.broadcast %10 : vector<1x32xf32> to vector<16x32xf32>
    %106 = arith.addf %104, %105 : vector<16x32xf32>
    %cst_25 = arith.constant dense<0.000000e+00> : vector<16x64xf32>
    %107 = tpu.matmul %106, %19, %cst_25 {dimension_numbers = #tpu.dot_dimension_numbers<[1], [0], [0], [1], [0, 0, 1, 1], [], []>} : vector<16x32xf32>, vector<32x64xf32>, vector<16x64xf32> -> vector<16x64xf32>
    %108 = vector.broadcast %11 : vector<1x64xf32> to vector<16x64xf32>
    %109 = arith.addf %107, %108 : vector<16x64xf32>
    %cst_26 = arith.constant 0.000000e+00 : f32
    %110 = vector.broadcast %cst_26 : f32 to vector<16x64xf32>
    %111 = arith.maximumf %109, %110 : vector<16x64xf32>
    %cst_27 = arith.constant dense<0.000000e+00> : vector<16x32xf32>
    %112 = tpu.matmul %111, %21, %cst_27 {dimension_numbers = #tpu.dot_dimension_numbers<[1], [0], [0], [1], [0, 0, 1, 1], [], []>} : vector<16x64xf32>, vector<64x32xf32>, vector<16x32xf32> -> vector<16x32xf32>
    %113 = vector.broadcast %12 : vector<1x32xf32> to vector<16x32xf32>
    %114 = arith.addf %112, %113 : vector<16x32xf32>
    %115 = arith.addf %106, %114 : vector<16x32xf32>
    %cst_28 = arith.constant dense<0.000000e+00> : vector<16xf32>
    %116 = vector.multi_reduction <add>, %115, %cst_28 [1] : vector<16x32xf32> to vector<16xf32>
    %117 = vector.shape_cast %116 : vector<16xf32> to vector<16x1xf32>
    %cst_29 = arith.constant 3.200000e+01 : f32
    %118 = vector.broadcast %cst_29 : f32 to vector<16x1xf32>
    %119 = arith.divf %117, %118 : vector<16x1xf32>
    %120 = vector.broadcast %119 : vector<16x1xf32> to vector<16x32xf32>
    %121 = arith.subf %115, %120 : vector<16x32xf32>
    %122 = arith.mulf %121, %121 : vector<16x32xf32>
    %cst_30 = arith.constant dense<0.000000e+00> : vector<16xf32>
    %123 = vector.multi_reduction <add>, %122, %cst_30 [1] : vector<16x32xf32> to vector<16xf32>
    %124 = vector.shape_cast %123 : vector<16xf32> to vector<16x1xf32>
    %cst_31 = arith.constant 3.200000e+01 : f32
    %125 = vector.broadcast %cst_31 : f32 to vector<16x1xf32>
    %126 = arith.divf %124, %125 : vector<16x1xf32>
    %127 = vector.broadcast %119 : vector<16x1xf32> to vector<16x32xf32>
    %128 = arith.subf %115, %127 : vector<16x32xf32>
    %cst_32 = arith.constant 9.99999974E-6 : f32
    %129 = vector.broadcast %cst_32 : f32 to vector<16x1xf32>
    %130 = arith.addf %126, %129 : vector<16x1xf32>
    %131 = math.rsqrt %130 : vector<16x1xf32>
    %132 = vector.broadcast %131 : vector<16x1xf32> to vector<16x32xf32>
    %133 = arith.mulf %128, %132 : vector<16x32xf32>
    %134 = vector.broadcast %13 : vector<1x32xf32> to vector<16x32xf32>
    %135 = arith.mulf %133, %134 : vector<16x32xf32>
    %136 = vector.broadcast %14 : vector<1x32xf32> to vector<16x32xf32>
    %137 = arith.addf %135, %136 : vector<16x32xf32>
    %c1 = arith.constant 1 : index
    %c0_33 = arith.constant 0 : index
    %c0_34 = arith.constant 0 : index
    %138 = vector.load %arg5[%c1, %c0_33, %c0_34] : memref<2x8x128xf32, #tpu.memory_space<vmem>>, vector<1x8x128xf32>
    %139 = vector.shape_cast %138 : vector<1x8x128xf32> to vector<8x128xf32>
    %140 = vector.extract_strided_slice %139 {offsets = [0, 0], sizes = [1, 96], strides = [1, 1]} : vector<8x128xf32> to vector<1x96xf32>
    %141 = vector.extract_strided_slice %139 {offsets = [1, 0], sizes = [1, 32], strides = [1, 1]} : vector<8x128xf32> to vector<1x32xf32>
    %142 = vector.extract_strided_slice %139 {offsets = [2, 0], sizes = [1, 32], strides = [1, 1]} : vector<8x128xf32> to vector<1x32xf32>
    %143 = vector.extract_strided_slice %139 {offsets = [3, 0], sizes = [1, 32], strides = [1, 1]} : vector<8x128xf32> to vector<1x32xf32>
    %144 = vector.extract_strided_slice %139 {offsets = [4, 0], sizes = [1, 64], strides = [1, 1]} : vector<8x128xf32> to vector<1x64xf32>
    %145 = vector.extract_strided_slice %139 {offsets = [5, 0], sizes = [1, 32], strides = [1, 1]} : vector<8x128xf32> to vector<1x32xf32>
    %146 = vector.extract_strided_slice %139 {offsets = [6, 0], sizes = [1, 32], strides = [1, 1]} : vector<8x128xf32> to vector<1x32xf32>
    %147 = vector.extract_strided_slice %139 {offsets = [7, 0], sizes = [1, 32], strides = [1, 1]} : vector<8x128xf32> to vector<1x32xf32>
    %c1_35 = arith.constant 1 : index
    %c0_36 = arith.constant 0 : index
    %c0_37 = arith.constant 0 : index
    %148 = vector.load %arg3[%c1_35, %c0_36, %c0_37] : memref<2x32x192xf32, #tpu.memory_space<vmem>>, vector<1x32x192xf32>
    %149 = vector.shape_cast %148 : vector<1x32x192xf32> to vector<32x192xf32>
    %150 = vector.extract_strided_slice %149 {offsets = [0, 0], sizes = [32, 96], strides = [1, 1]} : vector<32x192xf32> to vector<32x96xf32>
    %151 = vector.extract_strided_slice %149 {offsets = [0, 96], sizes = [32, 32], strides = [1, 1]} : vector<32x192xf32> to vector<32x32xf32>
    %152 = vector.extract_strided_slice %149 {offsets = [0, 128], sizes = [32, 64], strides = [1, 1]} : vector<32x192xf32> to vector<32x64xf32>
    %c1_38 = arith.constant 1 : index
    %c0_39 = arith.constant 0 : index
    %c0_40 = arith.constant 0 : index
    %153 = vector.load %arg4[%c1_38, %c0_39, %c0_40] : memref<2x64x32xf32, #tpu.memory_space<vmem>>, vector<1x64x32xf32>
    %154 = vector.shape_cast %153 : vector<1x64x32xf32> to vector<64x32xf32>
    %cst_41 = arith.constant dense<0.000000e+00> : vector<16x96xf32>
    %155 = tpu.matmul %137, %150, %cst_41 {dimension_numbers = #tpu.dot_dimension_numbers<[1], [0], [0], [1], [0, 0, 1, 1], [], []>} : vector<16x32xf32>, vector<32x96xf32>, vector<16x96xf32> -> vector<16x96xf32>
    %156 = vector.broadcast %140 : vector<1x96xf32> to vector<16x96xf32>
    %157 = arith.addf %155, %156 : vector<16x96xf32>
    %158 = vector.extract_strided_slice %157 {offsets = [0, 0], sizes = [16, 8], strides = [1, 1]} : vector<16x96xf32> to vector<16x8xf32>
    %159 = vector.shape_cast %158 : vector<16x8xf32> to vector<2x8x8xf32>
    %160 = vector.extract_strided_slice %157 {offsets = [0, 8], sizes = [16, 8], strides = [1, 1]} : vector<16x96xf32> to vector<16x8xf32>
    %161 = vector.shape_cast %160 : vector<16x8xf32> to vector<2x8x8xf32>
    %162 = vector.extract_strided_slice %157 {offsets = [0, 16], sizes = [16, 8], strides = [1, 1]} : vector<16x96xf32> to vector<16x8xf32>
    %163 = vector.shape_cast %162 : vector<16x8xf32> to vector<2x8x8xf32>
    %164 = vector.extract_strided_slice %157 {offsets = [0, 24], sizes = [16, 8], strides = [1, 1]} : vector<16x96xf32> to vector<16x8xf32>
    %165 = vector.shape_cast %164 : vector<16x8xf32> to vector<2x8x8xf32>
    %166 = vector.shape_cast %159 : vector<2x8x8xf32> to vector<1x2x8x8xf32>
    %167 = vector.shape_cast %161 : vector<2x8x8xf32> to vector<1x2x8x8xf32>
    %168 = vector.shape_cast %163 : vector<2x8x8xf32> to vector<1x2x8x8xf32>
    %169 = vector.shape_cast %165 : vector<2x8x8xf32> to vector<1x2x8x8xf32>
    %170 = tpu.concatenate %166, %167, %168, %169 in 0 : vector<1x2x8x8xf32>, vector<1x2x8x8xf32>, vector<1x2x8x8xf32>, vector<1x2x8x8xf32> -> vector<4x2x8x8xf32>
    %171 = vector.shape_cast %170 : vector<4x2x8x8xf32> to vector<8x8x8xf32>
    %172 = vector.extract_strided_slice %157 {offsets = [0, 32], sizes = [16, 8], strides = [1, 1]} : vector<16x96xf32> to vector<16x8xf32>
    %173 = vector.shape_cast %172 : vector<16x8xf32> to vector<2x8x8xf32>
    %174 = vector.extract_strided_slice %157 {offsets = [0, 40], sizes = [16, 8], strides = [1, 1]} : vector<16x96xf32> to vector<16x8xf32>
    %175 = vector.shape_cast %174 : vector<16x8xf32> to vector<2x8x8xf32>
    %176 = vector.extract_strided_slice %157 {offsets = [0, 48], sizes = [16, 8], strides = [1, 1]} : vector<16x96xf32> to vector<16x8xf32>
    %177 = vector.shape_cast %176 : vector<16x8xf32> to vector<2x8x8xf32>
    %178 = vector.extract_strided_slice %157 {offsets = [0, 56], sizes = [16, 8], strides = [1, 1]} : vector<16x96xf32> to vector<16x8xf32>
    %179 = vector.shape_cast %178 : vector<16x8xf32> to vector<2x8x8xf32>
    %180 = vector.shape_cast %173 : vector<2x8x8xf32> to vector<1x2x8x8xf32>
    %181 = vector.shape_cast %175 : vector<2x8x8xf32> to vector<1x2x8x8xf32>
    %182 = vector.shape_cast %177 : vector<2x8x8xf32> to vector<1x2x8x8xf32>
    %183 = vector.shape_cast %179 : vector<2x8x8xf32> to vector<1x2x8x8xf32>
    %184 = tpu.concatenate %180, %181, %182, %183 in 0 : vector<1x2x8x8xf32>, vector<1x2x8x8xf32>, vector<1x2x8x8xf32>, vector<1x2x8x8xf32> -> vector<4x2x8x8xf32>
    %185 = vector.shape_cast %184 : vector<4x2x8x8xf32> to vector<8x8x8xf32>
    %186 = vector.extract_strided_slice %157 {offsets = [0, 64], sizes = [16, 8], strides = [1, 1]} : vector<16x96xf32> to vector<16x8xf32>
    %187 = vector.shape_cast %186 : vector<16x8xf32> to vector<2x8x8xf32>
    %188 = vector.extract_strided_slice %157 {offsets = [0, 72], sizes = [16, 8], strides = [1, 1]} : vector<16x96xf32> to vector<16x8xf32>
    %189 = vector.shape_cast %188 : vector<16x8xf32> to vector<2x8x8xf32>
    %190 = vector.extract_strided_slice %157 {offsets = [0, 80], sizes = [16, 8], strides = [1, 1]} : vector<16x96xf32> to vector<16x8xf32>
    %191 = vector.shape_cast %190 : vector<16x8xf32> to vector<2x8x8xf32>
    %192 = vector.extract_strided_slice %157 {offsets = [0, 88], sizes = [16, 8], strides = [1, 1]} : vector<16x96xf32> to vector<16x8xf32>
    %193 = vector.shape_cast %192 : vector<16x8xf32> to vector<2x8x8xf32>
    %194 = vector.shape_cast %187 : vector<2x8x8xf32> to vector<1x2x8x8xf32>
    %195 = vector.shape_cast %189 : vector<2x8x8xf32> to vector<1x2x8x8xf32>
    %196 = vector.shape_cast %191 : vector<2x8x8xf32> to vector<1x2x8x8xf32>
    %197 = vector.shape_cast %193 : vector<2x8x8xf32> to vector<1x2x8x8xf32>
    %198 = tpu.concatenate %194, %195, %196, %197 in 0 : vector<1x2x8x8xf32>, vector<1x2x8x8xf32>, vector<1x2x8x8xf32>, vector<1x2x8x8xf32> -> vector<4x2x8x8xf32>
    %199 = vector.shape_cast %198 : vector<4x2x8x8xf32> to vector<8x8x8xf32>
    "tpu.trace_start"() <{level = 10 : i32, message = "gqd,gkd->gqk"}> : () -> ()
    %cst_42 = arith.constant dense<0.000000e+00> : vector<8x8x8xf32>
    %200 = tpu.matmul %171, %185, %cst_42 {dimension_numbers = #tpu.dot_dimension_numbers<[2], [2], [1], [1], [0, 0, 0, 1, 1, 1], [0], [0]>} : vector<8x8x8xf32>, vector<8x8x8xf32>, vector<8x8x8xf32> -> vector<8x8x8xf32>
    "tpu.trace_stop"() : () -> ()
    %cst_43 = arith.constant dense<0xFF800000> : vector<8x8xf32>
    %201 = vector.multi_reduction <maximumf>, %200, %cst_43 [2] : vector<8x8x8xf32> to vector<8x8xf32>
    %202 = vector.shape_cast %201 : vector<8x8xf32> to vector<8x8x1xf32>
    %203 = vector.broadcast %202 : vector<8x8x1xf32> to vector<8x8x8xf32>
    %204 = arith.subf %200, %203 : vector<8x8x8xf32>
    %205 = math.exp %204 : vector<8x8x8xf32>
    %cst_44 = arith.constant dense<0.000000e+00> : vector<8x8xf32>
    %206 = vector.multi_reduction <add>, %205, %cst_44 [2] : vector<8x8x8xf32> to vector<8x8xf32>
    %207 = vector.shape_cast %206 : vector<8x8xf32> to vector<8x8x1xf32>
    %208 = vector.broadcast %207 : vector<8x8x1xf32> to vector<8x8x8xf32>
    %209 = arith.divf %205, %208 : vector<8x8x8xf32>
    "tpu.trace_start"() <{level = 10 : i32, message = "gqk,gkd->gqd"}> : () -> ()
    %cst_45 = arith.constant dense<0.000000e+00> : vector<8x8x8xf32>
    %210 = tpu.matmul %209, %199, %cst_45 {dimension_numbers = #tpu.dot_dimension_numbers<[2], [1], [1], [2], [0, 0, 0, 1, 1, 2], [0], [0]>} : vector<8x8x8xf32>, vector<8x8x8xf32>, vector<8x8x8xf32> -> vector<8x8x8xf32>
    "tpu.trace_stop"() : () -> ()
    %211 = vector.shape_cast %210 : vector<8x8x8xf32> to vector<4x16x8xf32>
    %212 = vector.shape_cast %151 : vector<32x32xf32> to vector<4x8x32xf32>
    "tpu.trace_start"() <{level = 10 : i32, message = "hmd,hde->hme"}> : () -> ()
    %cst_46 = arith.constant dense<0.000000e+00> : vector<4x16x32xf32>
    %213 = tpu.matmul %211, %212, %cst_46 {dimension_numbers = #tpu.dot_dimension_numbers<[2], [1], [1], [2], [0, 0, 0, 1, 1, 2], [0], [0]>} : vector<4x16x8xf32>, vector<4x8x32xf32>, vector<4x16x32xf32> -> vector<4x16x32xf32>
    "tpu.trace_stop"() : () -> ()
    %cst_47 = arith.constant dense<0.000000e+00> : vector<16x32xf32>
    %214 = vector.multi_reduction <add>, %213, %cst_47 [0] : vector<4x16x32xf32> to vector<16x32xf32>
    %215 = vector.broadcast %141 : vector<1x32xf32> to vector<16x32xf32>
    %216 = arith.addf %214, %215 : vector<16x32xf32>
    %217 = arith.addf %137, %216 : vector<16x32xf32>
    %cst_48 = arith.constant dense<0.000000e+00> : vector<16xf32>
    %218 = vector.multi_reduction <add>, %217, %cst_48 [1] : vector<16x32xf32> to vector<16xf32>
    %219 = vector.shape_cast %218 : vector<16xf32> to vector<16x1xf32>
    %cst_49 = arith.constant 3.200000e+01 : f32
    %220 = vector.broadcast %cst_49 : f32 to vector<16x1xf32>
    %221 = arith.divf %219, %220 : vector<16x1xf32>
    %222 = vector.broadcast %221 : vector<16x1xf32> to vector<16x32xf32>
    %223 = arith.subf %217, %222 : vector<16x32xf32>
    %224 = arith.mulf %223, %223 : vector<16x32xf32>
    %cst_50 = arith.constant dense<0.000000e+00> : vector<16xf32>
    %225 = vector.multi_reduction <add>, %224, %cst_50 [1] : vector<16x32xf32> to vector<16xf32>
    %226 = vector.shape_cast %225 : vector<16xf32> to vector<16x1xf32>
    %cst_51 = arith.constant 3.200000e+01 : f32
    %227 = vector.broadcast %cst_51 : f32 to vector<16x1xf32>
    %228 = arith.divf %226, %227 : vector<16x1xf32>
    %229 = vector.broadcast %221 : vector<16x1xf32> to vector<16x32xf32>
    %230 = arith.subf %217, %229 : vector<16x32xf32>
    %cst_52 = arith.constant 9.99999974E-6 : f32
    %231 = vector.broadcast %cst_52 : f32 to vector<16x1xf32>
    %232 = arith.addf %228, %231 : vector<16x1xf32>
    %233 = math.rsqrt %232 : vector<16x1xf32>
    %234 = vector.broadcast %233 : vector<16x1xf32> to vector<16x32xf32>
    %235 = arith.mulf %230, %234 : vector<16x32xf32>
    %236 = vector.broadcast %142 : vector<1x32xf32> to vector<16x32xf32>
    %237 = arith.mulf %235, %236 : vector<16x32xf32>
    %238 = vector.broadcast %143 : vector<1x32xf32> to vector<16x32xf32>
    %239 = arith.addf %237, %238 : vector<16x32xf32>
    %cst_53 = arith.constant dense<0.000000e+00> : vector<16x64xf32>
    %240 = tpu.matmul %239, %152, %cst_53 {dimension_numbers = #tpu.dot_dimension_numbers<[1], [0], [0], [1], [0, 0, 1, 1], [], []>} : vector<16x32xf32>, vector<32x64xf32>, vector<16x64xf32> -> vector<16x64xf32>
    %241 = vector.broadcast %144 : vector<1x64xf32> to vector<16x64xf32>
    %242 = arith.addf %240, %241 : vector<16x64xf32>
    %cst_54 = arith.constant 0.000000e+00 : f32
    %243 = vector.broadcast %cst_54 : f32 to vector<16x64xf32>
    %244 = arith.maximumf %242, %243 : vector<16x64xf32>
    %cst_55 = arith.constant dense<0.000000e+00> : vector<16x32xf32>
    %245 = tpu.matmul %244, %154, %cst_55 {dimension_numbers = #tpu.dot_dimension_numbers<[1], [0], [0], [1], [0, 0, 1, 1], [], []>} : vector<16x64xf32>, vector<64x32xf32>, vector<16x32xf32> -> vector<16x32xf32>
    %246 = vector.broadcast %145 : vector<1x32xf32> to vector<16x32xf32>
    %247 = arith.addf %245, %246 : vector<16x32xf32>
    %248 = arith.addf %239, %247 : vector<16x32xf32>
    %cst_56 = arith.constant dense<0.000000e+00> : vector<16xf32>
    %249 = vector.multi_reduction <add>, %248, %cst_56 [1] : vector<16x32xf32> to vector<16xf32>
    %250 = vector.shape_cast %249 : vector<16xf32> to vector<16x1xf32>
    %cst_57 = arith.constant 3.200000e+01 : f32
    %251 = vector.broadcast %cst_57 : f32 to vector<16x1xf32>
    %252 = arith.divf %250, %251 : vector<16x1xf32>
    %253 = vector.broadcast %252 : vector<16x1xf32> to vector<16x32xf32>
    %254 = arith.subf %248, %253 : vector<16x32xf32>
    %255 = arith.mulf %254, %254 : vector<16x32xf32>
    %cst_58 = arith.constant dense<0.000000e+00> : vector<16xf32>
    %256 = vector.multi_reduction <add>, %255, %cst_58 [1] : vector<16x32xf32> to vector<16xf32>
    %257 = vector.shape_cast %256 : vector<16xf32> to vector<16x1xf32>
    %cst_59 = arith.constant 3.200000e+01 : f32
    %258 = vector.broadcast %cst_59 : f32 to vector<16x1xf32>
    %259 = arith.divf %257, %258 : vector<16x1xf32>
    %260 = vector.broadcast %252 : vector<16x1xf32> to vector<16x32xf32>
    %261 = arith.subf %248, %260 : vector<16x32xf32>
    %cst_60 = arith.constant 9.99999974E-6 : f32
    %262 = vector.broadcast %cst_60 : f32 to vector<16x1xf32>
    %263 = arith.addf %259, %262 : vector<16x1xf32>
    %264 = math.rsqrt %263 : vector<16x1xf32>
    %265 = vector.broadcast %264 : vector<16x1xf32> to vector<16x32xf32>
    %266 = arith.mulf %261, %265 : vector<16x32xf32>
    %267 = vector.broadcast %146 : vector<1x32xf32> to vector<16x32xf32>
    %268 = arith.mulf %266, %267 : vector<16x32xf32>
    %269 = vector.broadcast %147 : vector<1x32xf32> to vector<16x32xf32>
    %270 = arith.addf %268, %269 : vector<16x32xf32>
    %271 = vector.shape_cast %270 : vector<16x32xf32> to vector<2x8x32xf32>
    %c0_61 = arith.constant 0 : index
    %c0_62 = arith.constant 0 : index
    %c0_63 = arith.constant 0 : index
    %272 = vector.load %arg6[%c0_61, %c0_62, %c0_63] : memref<2x8x32xf32, #tpu.memory_space<vmem>>, vector<2x8x32xf32>
    tpu.vector_store %arg6[%c0_61, %c0_62, %c0_63], %271 {strides = array<i32>} : memref<2x8x32xf32, #tpu.memory_space<vmem>>, vector<2x8x32xf32>,
    return
  }
  func.func @transform_0(%arg0: i32) -> (i32, i32, i32) {
    %c0_i32 = arith.constant 0 : i32
    %c0_i32_0 = arith.constant 0 : i32
    %c0_i32_1 = arith.constant 0 : i32
    return %arg0, %c0_i32, %c0_i32_0 : i32, i32, i32
  }
  func.func @transform_1(%arg0: i32) -> (i32, i32, i32) {
    %c0_i32 = arith.constant 0 : i32
    %c0_i32_0 = arith.constant 0 : i32
    %c0_i32_1 = arith.constant 0 : i32
    %c0_i32_2 = arith.constant 0 : i32
    return %c0_i32, %c0_i32_0, %c0_i32_1 : i32, i32, i32
  }
  func.func @transform_2(%arg0: i32) -> (i32, i32, i32) {
    %c0_i32 = arith.constant 0 : i32
    %c0_i32_0 = arith.constant 0 : i32
    %c0_i32_1 = arith.constant 0 : i32
    %c0_i32_2 = arith.constant 0 : i32
    return %c0_i32, %c0_i32_0, %c0_i32_1 : i32, i32, i32
  }
  func.func @transform_3(%arg0: i32) -> (i32, i32, i32) {
    %c0_i32 = arith.constant 0 : i32
    %c0_i32_0 = arith.constant 0 : i32
    %c0_i32_1 = arith.constant 0 : i32
    %c0_i32_2 = arith.constant 0 : i32
    return %c0_i32, %c0_i32_0, %c0_i32_1 : i32, i32, i32
  }
  func.func @transform_4(%arg0: i32) -> (i32, i32, i32) {
    %c0_i32 = arith.constant 0 : i32
    %c0_i32_0 = arith.constant 0 : i32
    %c0_i32_1 = arith.constant 0 : i32
    %c0_i32_2 = arith.constant 0 : i32
    return %c0_i32, %c0_i32_0, %c0_i32_1 : i32, i32, i32
  }
  func.func @transform_5(%arg0: i32) -> (i32, i32, i32) {
    %c0_i32 = arith.constant 0 : i32
    %c0_i32_0 = arith.constant 0 : i32
    %c0_i32_1 = arith.constant 0 : i32
    return %arg0, %c0_i32, %c0_i32_0 : i32, i32, i32
  }
}

</mosaic_0001>

<bundles_post_ra>
// kernel: signal_att_forward.1
= control target key start
LH: loop header
LB: loop body
LE: loop exit
PB: predicated region body
PF: predicated region fallthrough
CT: control target
= control target key end

     0   :  { %10 = vsyncpa [#allocation3], 0  ;;  %s5550_s0 = inlined_call_operand.hbm [shape: f32[2,8,32], index: 0, kind: input, shape index: {}, may-alias: {0,5}]   ;;  %s5551_s1 = inlined_call_operand.vmem [shape: f32[1,8,32], index: 1, kind: input, shape index: {}]   ;;  %s5552_s2 = inlined_call_operand.vmem [shape: f32[2,32,192], index: 2, kind: input, shape index: {}]   ;;  %s5553_s3 = inlined_call_operand.vmem [shape: f32[2,64,32], index: 3, kind: input, shape index: {}]   ;;  %s5554_s4 = inlined_call_operand.vmem [shape: f32[2,8,128], index: 4, kind: input, shape index: {}]   ;;  %s5555_s5 = inlined_call_operand.hbm [shape: f32[2,8,32], index: 5, kind: output, shape index: {}, may-alias: {0,5}]  }
   0x1   :  { %11 = vsyncpa [#allocation4], 0  ;;  %s4841_s18 = smov [#allocation2]   ;;  %s4793_s22 = scalar_lea.hbm %s5550_s0, 256 }
   0x2   :  { %s17_s19 = sshll.u32 %s4841_s18, 4  ;;  %p4794_p0 = scmp.ne.s32.totalorder %s5550_s0, %s4793_s22  ;;  %s18_s19 = int_to_ptr.vmem [resolvable:$true] %s17_s19 }
   0x3   :  { %p4797_p1 = scmp.lt.u32.totalorder %s4793_s22, %s5550_s0 }
   0x5   :  { %p4799_p2 = pnand %p4797_p1, %p4794_p0 }
   0x7   :  { %4802 = shalt.err (!%p4799_p2)
}
   0x8   :  { %s4803_s27 = scalar_lea.vmem %s18_s19, 256  ;;  %p4808_p4 = scmp.lt.s32.totalorder %s18_s19, %s18_s19 }
   0x9   :  { %p4804_p3 = scmp.ne.s32.totalorder %s18_s19, %s4803_s27  ;;  %p4809_p5 = scmp.lt.s32.totalorder %s4803_s27, %s4803_s27 }
   0xb   :  { %p4810_p6 = por %p4809_p5, %p4808_p4 }
   0xd   :  { %p4811_p7 = pnand %p4810_p6, %p4804_p3 }
   0xf   :  { %4814 = shalt.err (!%p4811_p7)
}
  0x10   :  { %s4842_s28 = smov 128   ;;  %s4843_s29 = smov 8  }
  0x11   :  { %23 = dma.hbm_to_vmem [thread:$0]  %s5550_s0, 256, %s18_s19, [#allocation3], %s4842_s28, %s4842_s28, %s4843_s29  }
  0x12   :  { %4837 = dma.done.wait [#allocation3], 256  }
  0x13   :  { %4838 = vsyncadd [#allocation3], 4294967040  ;;  %v4901_v0 = vld [vmem:[%s5552_s2] sm:$0xff]  ;;  %v4906_v1 = vld [vmem:[%s5552_s2 + $0x10] sm:$0xff]  ;;  %vm61_vm0 = vcmask 261120   ;;  %v57_v11 = vlaneseq  ;;  %v4844_v17 = vmov 0.0  }
  0x14   :  { %v4911_v2 = vld [vmem:[%s5552_s2 + $0x20] sm:$0xff]  ;;  %v4637_v3 = vpack.c.bf16 %v4906_v1, %v4901_v0  ;;  %v4918_v4 = vld [vmem:[%s5552_s2 + $0x30] sm:$0xff]  ;;  %v36_v9 = vld [vmem:[#allocation2 + $0x8] sm:$0xff]  ;;  %4371 = vmatprep.subr.mxu1 %v4844_v17  ;;  %s4845_s17 = smov 112   ;;  %s4846_s18 = smov 120   ;;  %vm4847_vm1 = vmmov 0  }
  0x15   :  { %v35_v5 = vld [vmem:[#allocation2] sm:$0xff]  ;;  %v4641_v6 = vpack.c.bf16 %v4918_v4, %v4911_v2  ;;  %v4933_v12 = vshrl.u32 %v57_v11, 7  ;;  %4373 = vmatprep.mubr.msk.f32.mxu1 %vm4847_vm1, %v4844_v17  ;;  %s4848_s19 = smov 104   ;;  %s4849_s20 = smov 96   ;;  %vm159_vm2 = vcmask 64512   ;;  %vm1954_vm3 = vcmask 523264  }
  0x16   :  { %v37_v7 = vld [vmem:[%s5551_s1] sm:$0xff]  ;;  %4638 = vmatprep.subr.bf16.mxu0 %v4637_v3  ;;  %s4850_s21 = smov 64   ;;  %s4851_s22 = smov 32  }
  0x17   :  { %v4925_v8 = vadd.f32 %v37_v7, %v35_v5  ;;  %4640 = vmatpush3.bf16.msra.mxu0 %v4637_v3  ;;  %v4929_v10 = vadd.f32 %v37_v7, %v36_v9  ;;  %v59_v13 = vsub.s32 0, %v4933_v12  ;;  %v4939_v14 = vld [vmem:[%s5554_s4] sm:$0xff] }
  0x18   :  { %4642 = vmatprep.subr.bf16.mxu0 %v4641_v6 }
  0x19   :  { %4363 = vmatprep.mubr.msk.f32.mxu0 %vm61_vm0, %v4925_v8  ;;  %v60_v15 = vrot.slane %v4939_v14, %v59_v13 }
  0x1b   :  { %4644 = vmatpush3.bf16.msra.mxu0 %v4641_v6 }
  0x1c   :  { %4366 = vmatprep.subr.mxu0 %v4844_v17 }
  0x1e   :  { %4364 = vmatmul.mubr.msk.f32.vlgmr.msra.gmra.mrb[0].mxu0 %vm61_vm0, %v4929_v10 }
  0x1f   :  { %4368 = vmatprep.mubr.msk.f32.mxu0 %vm4847_vm1, %v4844_v17 }
  0xf1   :  { %v4365_v16 = vpop.f32.mrb[0].mxu0 }
  0xf2   :  { %v134_v18 = vpop.f32.mrb[1].mxu0  ;;  %v4956_v20 = vadd.f32 %v4365_v16, %v60_v15 }
  0xf3   :  { %v4946_v19 = vadd.f32 %v134_v18, %v60_v15 }
  0xf5   :  { %149 = vrot.lane.b32.xlu1 %v4946_v19, %s4845_s17  ;;  %145 = vrot.lane.b32.xlu0 %v4946_v19, %s4846_s18 }
  0xf9   :  { %151 = vrot.lane.b32.xlu1 %v4956_v20, %s4845_s17  ;;  %147 = vrot.lane.b32.xlu0 %v4956_v20, %s4846_s18 }
  0xfd   :  { %155 = vrot.lane.b32.xlu1 %v4956_v20, %s4848_s19  ;;  %153 = vrot.lane.b32.xlu0 %v4946_v19, %s4848_s19 }
 0x101   :  { %234 = vrot.lane.b32.xlu1 %v4956_v20, %s4849_s20  ;;  %157 = vrot.lane.b32.xlu0 %v4946_v19, %s4849_s20 }
 0x167   :  { %v4970_v21 = vpop.permute.xlu1 %149  ;;  %v4972_v22 = vpop.permute.xlu0 %145 }
 0x168   :  { %310 = vrot.lane.b32.xlu0 %v4972_v22, %s4849_s20 }
 0x16b   :  { %v4976_v23 = vpop.permute.xlu1 %151  ;;  %v4978_v24 = vpop.permute.xlu0 %147 }
 0x16c   :  { %462 = vrot.lane.b32.xlu0 %v4970_v21, %s4849_s20  ;;  %386 = vrot.lane.b32.xlu1 %v4978_v24, %s4849_s20 }
 0x16f   :  { %v4984_v25 = vpop.permute.xlu1 %155  ;;  %v4986_v26 = vpop.permute.xlu0 %153 }
 0x170   :  { %538 = vrot.lane.b32.xlu1 %v4976_v23, %s4849_s20  ;;  %614 = vrot.lane.b32.xlu0 %v4986_v26, %s4849_s20 }
 0x173   :  { %v235_v27 = vpop.permute.xlu1 %234  ;;  %v158_v28 = vpop.permute.xlu0 %157 }
 0x174   :  { %4372 = vmatpush3.xpose.msk.msra.mxu1 %vm159_vm2, %v235_v27  ;;  %690 = vrot.lane.b32.xlu1 %v4984_v25, %s4849_s20 }
 0x175   :  { %4367 = vmatpush3.xpose.msk.msra.mxu0 %vm159_vm2, %v158_v28  ;;  %4381 = vmatprep.subr.mxu1 %v4844_v17 }
 0x176   :  { %4376 = vmatprep.subr.mxu0 %v4844_v17 }
 0x177   :  { %4374 = vmatmul.mubr.msk.f32.vlgmr.msra.gmra.mrb[0].mxu1 %vm159_vm2, %v4956_v20 }
 0x178   :  { %4369 = vmatmul.mubr.msk.f32.vlgmr.msra.gmra.mrb[2].mxu0 %vm159_vm2, %v4946_v19  ;;  %4383 = vmatprep.mubr.msk.f32.mxu1 %vm4847_vm1, %v4844_v17 }
 0x179   :  { %4378 = vmatprep.mubr.msk.f32.mxu0 %vm4847_vm1, %v4844_v17 }
 0x1da   :  { %v311_v29 = vpop.permute.xlu0 %310 }
 0x1db   :  { %4377 = vmatpush3.xpose.msk.msra.mxu0 %vm159_vm2, %v311_v29 }
 0x1dc   :  { %4386 = vmatprep.subr.mxu0 %v4844_v17 }
 0x1de   :  { %v387_v30 = vpop.permute.xlu1 %386  ;;  %4379 = vmatmul.mubr.msk.f32.vlgmr.msra.gmra.mrb[4].mxu0 %vm159_vm2, %v4972_v22  ;;  %v463_v31 = vpop.permute.xlu0 %462 }
 0x1df   :  { %4382 = vmatpush3.xpose.msk.msra.mxu1 %vm159_vm2, %v387_v30  ;;  %4387 = vmatpush3.xpose.msk.msra.mxu0 %vm159_vm2, %v463_v31 }
 0x1e0   :  { %4388 = vmatprep.mubr.msk.f32.mxu0 %vm4847_vm1, %v4844_v17  ;;  %4391 = vmatprep.subr.mxu1 %v4844_v17 }
 0x1e1   :  { %4396 = vmatprep.subr.mxu0 %v4844_v17 }
 0x1e2   :  { %4384 = vmatmul.mubr.msk.f32.vlgmr.msra.gmra.mrb[2].mxu1 %vm159_vm2, %v4978_v24  ;;  %v539_v32 = vpop.permute.xlu1 %538  ;;  %4389 = vmatmul.mubr.msk.f32.vlgmr.msra.gmra.mrb[6].mxu0 %vm159_vm2, %v4970_v21  ;;  %v615_v33 = vpop.permute.xlu0 %614 }
 0x1e3   :  { %4392 = vmatpush3.xpose.msk.msra.mxu1 %vm159_vm2, %v539_v32  ;;  %4397 = vmatpush3.xpose.msk.msra.mxu0 %vm159_vm2, %v615_v33 }
 0x1e4   :  { %4393 = vmatprep.mubr.msk.f32.mxu1 %vm4847_vm1, %v4844_v17  ;;  %4398 = vmatprep.mubr.msk.f32.mxu0 %vm4847_vm1, %v4844_v17 }
 0x1e5   :  { %4401 = vmatprep.subr.mxu1 %v4844_v17  ;;  %4406 = vmatprep.subr.mxu0 %v4844_v17 }
 0x1e6   :  { %4394 = vmatmul.mubr.msk.f32.vlgmr.msra.gmra.mrb[4].mxu1 %vm159_vm2, %v4976_v23  ;;  %v691_v34 = vpop.permute.xlu1 %690  ;;  %4399 = vmatmul.mubr.msk.f32.vlgmr.msra.gmra.mrb[8].mxu0 %vm159_vm2, %v4986_v26 }
 0x1e7   :  { %4402 = vmatpush3.xpose.msk.msra.mxu1 %vm159_vm2, %v691_v34  ;;  %4403 = vmatprep.mubr.msk.f32.mxu1 %vm4847_vm1, %v4844_v17 }
 0x1e8   :  { %4411 = vmatprep.subr.mxu1 %v4844_v17  ;;  %4408 = vmatprep.mubr.msk.f32.mxu0 %vm4847_vm1, %v4844_v17 }
 0x1ea   :  { %4404 = vmatmul.mubr.msk.f32.vlgmr.msra.gmra.mrb[6].mxu1 %vm159_vm2, %v4984_v25 }
 0x1eb   :  { %4413 = vmatprep.mubr.msk.f32.mxu1 %vm4847_vm1, %v4844_v17 }
 0x24a   :  { %v306_v35 = vpop.f32.mrb[0].mxu1 }
 0x24b   :  { %v230_v36 = vpop.f32.mrb[2].mxu0  ;;  %v4375_v37 = vpop.f32.mrb[1].mxu1  ;;  %v769_v38 = vsel %vm159_vm2, %v306_v35, -inf }
 0x24c   :  { %v4370_v39 = vpop.f32.mrb[3].mxu0  ;;  %770 = vmax.xlane.f32.xlu1 %v769_v38  ;;  %v766_v40 = vsel %vm159_vm2, %v230_v36, -inf }
 0x24d   :  { %767 = vmax.xlane.f32.xlu0 %v766_v40 }
 0x2b1   :  { %v382_v41 = vpop.f32.mrb[4].mxu0 }
 0x2b2   :  { %v4380_v42 = vpop.f32.mrb[5].mxu0  ;;  %v772_v43 = vsel %vm159_vm2, %v382_v41, -inf }
 0x2b3   :  { %773 = vmax.xlane.f32.xlu0 %v772_v43 }
 0x2b5   :  { %v458_v44 = vpop.f32.mrb[2].mxu1  ;;  %v534_v45 = vpop.f32.mrb[6].mxu0 }
 0x2b6   :  { %v4385_v46 = vpop.f32.mrb[3].mxu1  ;;  %v4390_v47 = vpop.f32.mrb[7].mxu0  ;;  %v775_v48 = vsel %vm159_vm2, %v458_v44, -inf  ;;  %v778_v49 = vsel %vm159_vm2, %v534_v45, -inf }
 0x2b7   :  { %776 = vmax.xlane.f32.xlu0 %v775_v48  ;;  %779 = vmax.xlane.f32.xlu1 %v778_v49 }
 0x2b9   :  { %v610_v50 = vpop.f32.mrb[4].mxu1  ;;  %v686_v51 = vpop.f32.mrb[8].mxu0 }
 0x2ba   :  { %v4395_v52 = vpop.f32.mrb[5].mxu1  ;;  %v4400_v53 = vpop.f32.mrb[9].mxu0  ;;  %v781_v54 = vsel %vm159_vm2, %v610_v50, -inf  ;;  %v784_v55 = vsel %vm159_vm2, %v686_v51, -inf }
 0x2bb   :  { %782 = vmax.xlane.f32.xlu0 %v781_v54  ;;  %785 = vmax.xlane.f32.xlu1 %v784_v55 }
 0x2bd   :  { %v762_v56 = vpop.f32.mrb[6].mxu1 }
 0x2be   :  { %v4405_v57 = vpop.f32.mrb[7].mxu1  ;;  %v787_v58 = vsel %vm159_vm2, %v762_v56, -inf }
 0x2bf   :  { %788 = vmax.xlane.f32.xlu0 %v787_v58 }
 0x2cc   :  { %854 = vrot.lane.b32.xlu1 %v4946_v19, %s4850_s21 }
 0x2d0   :  { %1006 = vrot.lane.b32.xlu1 %v4972_v22, %s4850_s21 }
 0x2d4   :  { %1082 = vrot.lane.b32.xlu1 %v4978_v24, %s4850_s21 }
 0x2d5   :  { %930 = vrot.lane.b32.xlu0 %v4956_v20, %s4850_s21 }
 0x2d8   :  { %1234 = vrot.lane.b32.xlu1 %v4976_v23, %s4850_s21 }
 0x2d9   :  { %1158 = vrot.lane.b32.xlu0 %v4970_v21, %s4850_s21  ;;  %v771_v59 = vpop.xlane.xlu1 %770 }
 0x2da   :  { %v791_v60 = vsub.f32 %v306_v35, %v771_v59  ;;  %v768_v61 = vpop.xlane.xlu0 %767 }
 0x2db   :  { %v790_v63 = vsub.f32 %v230_v36, %v768_v61 }
 0x2dc   :  { %v800_v62 = vmul.f32 1.442695, %v791_v60 }
 0x2dd   :  { %v798_v3 = vmul.f32 1.442695, %v790_v63 }
 0x2de   :  { %4713 = vpow2.f32 %v800_v62 }
 0x2df   :  { %4715 = vpow2.f32 %v798_v3 }
 0x2e8   :  { %v5062_v5 = vpop.eup %4713 }
 0x2e9   :  { %v817_v6 = vsel %vm159_vm2, %v5062_v5, 0.0  ;;  %v5066_v7 = vpop.eup %4715 }
 0x2ea   :  { %v814_v9 = vsel %vm159_vm2, %v5066_v7, 0.0 }
 0x2f8   :  { %818 = vadd.xlane.f32.xlu0 %v817_v6 }
 0x2fc   :  { %815 = vadd.xlane.f32.xlu1 %v814_v9 }
 0x340   :  { %v774_v11 = vpop.xlane.xlu0 %773 }
 0x341   :  { %v792_v15 = vsub.f32 %v382_v41, %v774_v11 }
 0x343   :  { %v802_v16 = vmul.f32 1.442695, %v792_v15 }
 0x344   :  { %v780_v18 = vpop.xlane.xlu1 %779  ;;  %v777_v19 = vpop.xlane.xlu0 %776 }
 0x345   :  { %4717 = vpow2.f32 %v802_v16  ;;  %v794_v20 = vsub.f32 %v534_v45, %v780_v18  ;;  %v793_v21 = vsub.f32 %v458_v44, %v777_v19 }
 0x347   :  { %v806_v22 = vmul.f32 1.442695, %v794_v20  ;;  %v804_v23 = vmul.f32 1.442695, %v793_v21 }
 0x348   :  { %v786_v24 = vpop.xlane.xlu1 %785  ;;  %v783_v27 = vpop.xlane.xlu0 %782 }
 0x349   :  { %4719 = vpow2.f32 %v806_v22  ;;  %v796_v28 = vsub.f32 %v686_v51, %v786_v24  ;;  %v795_v29 = vsub.f32 %v610_v50, %v783_v27 }
 0x34a   :  { %4721 = vpow2.f32 %v804_v23 }
 0x34b   :  { %v810_v30 = vmul.f32 1.442695, %v796_v28  ;;  %v808_v31 = vmul.f32 1.442695, %v795_v29 }
 0x34c   :  { %v855_v32 = vpop.permute.xlu1 %854  ;;  %v789_v33 = vpop.xlane.xlu0 %788 }
 0x34d   :  { %4723 = vpow2.f32 %v810_v30  ;;  %v797_v34 = vsub.f32 %v762_v56, %v789_v33  ;;  %4407 = vmatpush3.msra.mxu0 %v855_v32 }
 0x34e   :  { %4725 = vpow2.f32 %v808_v31  ;;  %4416 = vmatprep.subr.mxu0 %v4844_v17 }
 0x34f   :  { %v4718_v35 = vpop.eup %4717  ;;  %v812_v36 = vmul.f32 1.442695, %v797_v34 }
 0x350   :  { %v931_v37 = vpop.permute.xlu0 %930  ;;  %v820_v38 = vsel %vm159_vm2, %v4718_v35, 0.0  ;;  %v1007_v49 = vpop.permute.xlu1 %1006 }
 0x351   :  { %4727 = vpow2.f32 %v812_v36  ;;  %821 = vadd.xlane.f32.xlu1 %v820_v38  ;;  %4412 = vmatpush3.msra.mxu1 %v931_v37 }
 0x352   :  { %4421 = vmatprep.subr.mxu1 %v4844_v17 }
 0x353   :  { %v4720_v39 = vpop.eup %4719 }
 0x354   :  { %v4722_v40 = vpop.eup %4721  ;;  %v826_v41 = vsel %vm159_vm2, %v4720_v39, 0.0  ;;  %v1083_v50 = vpop.permute.xlu1 %1082 }
 0x355   :  { %827 = vadd.xlane.f32.xlu1 %v826_v41  ;;  %v823_v42 = vsel %vm159_vm2, %v4722_v40, 0.0  ;;  %v1159_v51 = vpop.permute.xlu0 %1158 }
 0x356   :  { %824 = vadd.xlane.f32.xlu0 %v823_v42 }
 0x357   :  { %v5075_v43 = vpop.eup %4723 }
 0x358   :  { %v5077_v44 = vpop.eup %4725  ;;  %v832_v45 = vsel %vm159_vm2, %v5075_v43, 0.0 }
 0x359   :  { %833 = vadd.xlane.f32.xlu1 %v832_v45  ;;  %v829_v46 = vsel %vm159_vm2, %v5077_v44, 0.0 }
 0x35a   :  { %830 = vadd.xlane.f32.xlu0 %v829_v46 }
 0x35b   :  { %v5083_v47 = vpop.eup %4727 }
 0x35c   :  { %v835_v48 = vsel %vm159_vm2, %v5083_v47, 0.0 }
 0x35e   :  { %836 = vadd.xlane.f32.xlu0 %v835_v48 }
 0x36a   :  { %1386 = vrot.lane.b32.xlu1 %v4984_v25, %s4850_s21  ;;  %v1235_v25 = vpop.permute.xlu1 %1234 }
 0x36e   :  { %1548 = vrot.lane.b32.xlu1 %v4906_v1, %s4851_s22 }
 0x372   :  { %1718 = vrot.lane.b32.xlu1 %v4918_v4, %s4851_s22 }
 0x374   :  { %1310 = vrot.lane.b32.xlu0 %v4986_v26, %s4850_s21 }
 0x378   :  { %1463 = vrot.lane.b32.xlu0 %v4901_v0, %s4851_s22 }
 0x37c   :  { %1633 = vrot.lane.b32.xlu0 %v4911_v2, %s4851_s22 }
 0x385   :  { %v819_v52 = vpop.xlane.xlu0 %818 }
 0x386   :  { %4729 = vrcp.f32 %v819_v52 }
 0x389   :  { %v816_v26 = vpop.xlane.xlu1 %815 }
 0x38a   :  { %4731 = vrcp.f32 %v816_v26 }
 0x390   :  { %v4730_v53 = vpop.eup %4729 }
 0x391   :  { %v841_v0 = vmul.f32 %v4730_v53, %v5062_v5 }
 0x393   :  { %4414 = vmatmul.mubr.msk.f32.vlgmr.msra.gmra.mrb[8].mxu1 %vm159_vm2, %v841_v0 }
 0x394   :  { %v4732_v1 = vpop.eup %4731  ;;  %4422 = vmatpush3.msra.mxu1 %v1083_v50  ;;  %4423 = vmatprep.mubr.msk.f32.mxu1 %vm4847_vm1, %v4844_v17 }
 0x395   :  { %v839_v2 = vmul.f32 %v4732_v1, %v5066_v7  ;;  %4431 = vmatprep.subr.mxu1 %v4844_v17 }
 0x397   :  { %4409 = vmatmul.mubr.msk.f32.vlgmr.msra.gmra.mrb[10].mxu0 %vm159_vm2, %v839_v2 }
 0x398   :  { %4417 = vmatpush3.msra.mxu0 %v1007_v49  ;;  %4418 = vmatprep.mubr.msk.f32.mxu0 %vm4847_vm1, %v4844_v17 }
 0x399   :  { %4426 = vmatprep.subr.mxu0 %v4844_v17 }
 0x3de   :  { %v822_v4 = vpop.xlane.xlu1 %821 }
 0x3df   :  { %4733 = vrcp.f32 %v822_v4 }
 0x3e2   :  { %v828_v54 = vpop.xlane.xlu1 %827 }
 0x3e3   :  { %4735 = vrcp.f32 %v828_v54  ;;  %v825_v55 = vpop.xlane.xlu0 %824 }
 0x3e4   :  { %4737 = vrcp.f32 %v825_v55 }
 0x3e6   :  { %v834_v56 = vpop.xlane.xlu1 %833 }
 0x3e7   :  { %4739 = vrcp.f32 %v834_v56  ;;  %v831_v57 = vpop.xlane.xlu0 %830 }
 0x3e8   :  { %4741 = vrcp.f32 %v831_v57 }
 0x3e9   :  { %v4734_v58 = vpop.eup %4733 }
 0x3ea   :  { %v843_v59 = vmul.f32 %v4734_v58, %v4718_v35  ;;  %v1387_v16 = vpop.permute.xlu1 %1386 }
 0x3eb   :  { %v837_v60 = vpop.xlane.xlu0 %836 }
 0x3ec   :  { %4743 = vrcp.f32 %v837_v60  ;;  %4419 = vmatmul.mubr.msk.f32.vlgmr.msra.gmra.mrb[12].mxu0 %vm159_vm2, %v843_v59 }
 0x3ed   :  { %v4736_v61 = vpop.eup %4735  ;;  %4427 = vmatpush3.msra.mxu0 %v1159_v51  ;;  %4428 = vmatprep.mubr.msk.f32.mxu0 %vm4847_vm1, %v4844_v17 }
 0x3ee   :  { %v4738_v62 = vpop.eup %4737  ;;  %v847_v63 = vmul.f32 %v4736_v61, %v4720_v39  ;;  %4436 = vmatprep.subr.mxu0 %v4844_v17  ;;  %v1549_v20 = vpop.permute.xlu1 %1548 }
 0x3ef   :  { %v845_v3 = vmul.f32 %v4738_v62, %v4722_v40  ;;  %v1311_v5 = vpop.permute.xlu0 %1310 }
 0x3f0   :  { %4429 = vmatmul.mubr.msk.f32.vlgmr.msra.gmra.mrb[14].mxu0 %vm159_vm2, %v847_v63 }
 0x3f1   :  { %v4740_v6 = vpop.eup %4739  ;;  %4424 = vmatmul.mubr.msk.f32.vlgmr.msra.gmra.mrb[10].mxu1 %vm159_vm2, %v845_v3  ;;  %4437 = vmatpush3.msra.mxu0 %v1311_v5 }
 0x3f2   :  { %v4742_v7 = vpop.eup %4741  ;;  %v851_v9 = vmul.f32 %v4740_v6, %v5075_v43  ;;  %4432 = vmatpush3.msra.mxu1 %v1235_v25  ;;  %4433 = vmatprep.mubr.msk.f32.mxu1 %vm4847_vm1, %v4844_v17  ;;  %v1719_v22 = vpop.permute.xlu1 %1718  ;;  %v1818_v25 = vsub.s32 1, %v4933_v12 }
 0x3f3   :  { %v849_v11 = vmul.f32 %v4742_v7, %v5077_v44  ;;  %4438 = vmatprep.mubr.msk.f32.mxu0 %vm4847_vm1, %v4844_v17  ;;  %4441 = vmatprep.subr.mxu1 %v4844_v17  ;;  %v1464_v15 = vpop.permute.xlu0 %1463 }
 0x3f4   :  { %4439 = vmatmul.mubr.msk.f32.vlgmr.msra.gmra.mrb[16].mxu0 %vm159_vm2, %v851_v9  ;;  %4446 = vmatprep.subr.mxu0 %v1464_v15  ;;  %v1819_v4 = vrot.slane %v4939_v14, %v1818_v25 }
 0x3f5   :  { %4434 = vmatmul.mubr.msk.f32.vlgmr.msra.gmra.mrb[12].mxu1 %vm159_vm2, %v849_v11  ;;  %4447 = vmatpush3.msra.mxu0 %v1464_v15 }
 0x3f6   :  { %v4744_v18 = vpop.eup %4743  ;;  %4442 = vmatpush3.msra.mxu1 %v1387_v16  ;;  %4443 = vmatprep.mubr.msk.f32.mxu1 %vm4847_vm1, %v4844_v17 }
 0x3f7   :  { %v853_v19 = vmul.f32 %v4744_v18, %v5083_v47  ;;  %4451 = vmatprep.subr.mxu1 %v1549_v20  ;;  %v1634_v21 = vpop.permute.xlu0 %1633 }
 0x3f8   :  { %4456 = vmatprep.subr.mxu0 %v1634_v21 }
 0x3f9   :  { %4444 = vmatmul.mubr.msk.f32.vlgmr.msra.gmra.mrb[14].mxu1 %vm159_vm2, %v853_v19 }
 0x3fa   :  { %4452 = vmatpush3.msra.mxu1 %v1549_v20  ;;  %v44_v20 = vld [vmem:[%s5552_s2 + $0x18] sm:$0xff] }
 0x3fb   :  { %4461 = vmatprep.subr.mxu1 %v1719_v22 }
 0x466   :  { %v1002_v23 = vpop.f32.mrb[8].mxu1 }
 0x467   :  { %v4415_v24 = vpop.f32.mrb[9].mxu1 }
 0x46a   :  { %v926_v27 = vpop.f32.mrb[10].mxu0 }
 0x46b   :  { %v4410_v28 = vpop.f32.mrb[11].mxu0  ;;  %4448 = vmatprep.mubr.msk.f32.mxu0 %vm159_vm2, %v926_v27  ;;  %v49_v27 = vld [vmem:[%s5553_s3] sm:$0xff] }
 0x46c   :  { %4449 = vmatmul.mubr.msk.f32.vlgmr.msra.gmra.mrb[18].mxu0 %vm159_vm2, %v1002_v23  ;;  %v48_v23 = vld [vmem:[%s5552_s2 + $0x38] sm:$0xff]  ;;  %v50_v28 = vld [vmem:[%s5553_s3 + $0x8] sm:$0xff] }
 0x46d   :  { %4457 = vmatpush3.msra.mxu0 %v1634_v21 }
 0x4bf   :  { %v1078_v29 = vpop.f32.mrb[12].mxu0 }
 0x4c0   :  { %v4420_v30 = vpop.f32.mrb[13].mxu0  ;;  %4453 = vmatprep.mubr.msk.f32.mxu1 %vm159_vm2, %v1078_v29  ;;  %v51_v29 = vld [vmem:[%s5553_s3 + $0x10] sm:$0xff] }
 0x4c1   :  { %v4653_v30 = vpack.c.bf16 %v50_v28, %v49_v27  ;;  %v5225_v27 = vld [vmem:[%s5552_s2 + $0x50] sm:$0xff] }
 0x4c3   :  { %v1230_v31 = vpop.f32.mrb[14].mxu0 }
 0x4c4   :  { %v1154_v32 = vpop.f32.mrb[10].mxu1  ;;  %v4430_v33 = vpop.f32.mrb[15].mxu0  ;;  %4458 = vmatprep.mubr.msk.f32.mxu0 %vm159_vm2, %v1230_v31  ;;  %v52_v31 = vld [vmem:[%s5553_s3 + $0x18] sm:$0xff] }
 0x4c5   :  { %v4425_v34 = vpop.f32.mrb[11].mxu1  ;;  %4454 = vmatmul.mubr.msk.f32.vlgmr.msra.gmra.mrb[16].mxu1 %vm159_vm2, %v1154_v32  ;;  %v4657_v32 = vpack.c.bf16 %v52_v31, %v51_v29  ;;  %v53_v33 = vld [vmem:[%s5553_s3 + $0x20] sm:$0xff] }
 0x4c6   :  { %4462 = vmatpush3.msra.mxu1 %v1719_v22  ;;  %v46_v22 = vld [vmem:[%s5552_s2 + $0x28] sm:$0xff]  ;;  %v5232_v29 = vld [vmem:[%s5552_s2 + $0x60] sm:$0xff] }
 0x4c7   :  { %v1382_v35 = vpop.f32.mrb[16].mxu0  ;;  %v4649_v24 = vpack.c.bf16 %v48_v23, %v46_v22  ;;  %v54_v34 = vld [vmem:[%s5553_s3 + $0x28] sm:$0xff]  ;;  %4654 = vmatprep.subr.bf16.mxu1 %v4653_v30 }
 0x4c8   :  { %v1306_v36 = vpop.f32.mrb[12].mxu1  ;;  %v4440_v37 = vpop.f32.mrb[17].mxu0  ;;  %4463 = vmatprep.mubr.msk.f32.mxu1 %vm159_vm2, %v1382_v35  ;;  %v4661_v35 = vpack.c.bf16 %v54_v34, %v53_v33 }
 0x4c9   :  { %v4435_v38 = vpop.f32.mrb[13].mxu1  ;;  %4459 = vmatmul.mubr.msk.f32.vlgmr.msra.gmra.mrb[20].mxu0 %vm159_vm2, %v1306_v36 }
 0x4cc   :  { %v1458_v39 = vpop.f32.mrb[14].mxu1 }
 0x4cd   :  { %v4445_v40 = vpop.f32.mrb[15].mxu1  ;;  %4464 = vmatmul.mubr.msk.f32.vlgmr.msra.gmra.mrb[18].mxu1 %vm159_vm2, %v1458_v39 }
 0x4ce   :  { %4656 = vmatpush3.bf16.msra.mxu1 %v4653_v30  ;;  %v5237_v30 = vld [vmem:[%s5552_s2 + $0x70] sm:$0xff] }
 0x4cf   :  { %4658 = vmatprep.subr.bf16.mxu1 %v4657_v32  ;;  %v4673_v31 = vpack.c.bf16 %v5237_v30, %v5232_v29 }
 0x4d2   :  { %4660 = vmatpush3.bf16.msra.mxu1 %v4657_v32 }
 0x4d3   :  { %4662 = vmatprep.subr.bf16.mxu1 %v4661_v35 }
 0x4d6   :  { %4664 = vmatpush3.bf16.msra.mxu1 %v4661_v35 }
 0x53f   :  { %v4450_v41 = vpop.f32.mrb[18].mxu0 }
 0x540   :  { %v1538_v42 = vpop.f32.mrb[19].mxu0  ;;  %v1809_v44 = vsel %vm61_vm0, %v4450_v41, 0.0 }
 0x541   :  { %v1802_v47 = vsel %vm61_vm0, %v1538_v42, 0.0  ;;  %v1853_v42 = vsub.s32 2, %v4933_v12 }
 0x598   :  { %v4455_v43 = vpop.f32.mrb[16].mxu1 }
 0x599   :  { %v1810_v45 = vsel %vm61_vm0, %v4455_v43, 0.0  ;;  %v1623_v46 = vpop.f32.mrb[17].mxu1  ;;  %v1859_v43 = vsub.s32 3, %v4933_v12 }
 0x59a   :  { %v1811_v48 = vadd.f32 %v1810_v45, %v1809_v44  ;;  %v1803_v49 = vsel %vm61_vm0, %v1623_v46, 0.0  ;;  %v1854_v44 = vrot.slane %v4939_v14, %v1853_v42 }
 0x59b   :  { %v1804_v50 = vadd.f32 %v1803_v49, %v1802_v47  ;;  %v1860_v47 = vrot.slane %v4939_v14, %v1859_v43 }
 0x59c   :  { %v4460_v51 = vpop.f32.mrb[20].mxu0 }
 0x59d   :  { %v1812_v52 = vsel %vm61_vm0, %v4460_v51, 0.0  ;;  %v1708_v26 = vpop.f32.mrb[21].mxu0 }
 0x59e   :  { %v1813_v53 = vadd.f32 %v1812_v52, %v1811_v48  ;;  %v1805_v0 = vsel %vm61_vm0, %v1708_v26, 0.0 }
 0x59f   :  { %v1806_v1 = vadd.f32 %v1805_v0, %v1804_v50  ;;  %v56_v0 = vld [vmem:[%s5553_s3 + $0x38] sm:$0xff] }
 0x5a0   :  { %v4465_v2 = vpop.f32.mrb[18].mxu1 }
 0x5a1   :  { %v1814_v54 = vsel %vm61_vm0, %v4465_v2, 0.0  ;;  %v1793_v55 = vpop.f32.mrb[19].mxu1  ;;  %v1865_v2 = vsub.s32 4, %v4933_v12 }
 0x5a2   :  { %v1815_v56 = vadd.f32 %v1814_v54, %v1813_v53  ;;  %v1807_v57 = vsel %vm61_vm0, %v1793_v55, 0.0  ;;  %v55_v53 = vld [vmem:[%s5553_s3 + $0x30] sm:$0xff] }
 0x5a3   :  { %v1808_v58 = vadd.f32 %v1807_v57, %v1806_v1  ;;  %v4665_v1 = vpack.c.bf16 %v56_v0, %v55_v53 }
 0x5a4   :  { %v1821_v59 = vadd.f32 %v1819_v4, %v1815_v56 }
 0x5a5   :  { %v1820_v60 = vadd.f32 %v1819_v4, %v1808_v58  ;;  %4666 = vmatprep.subr.bf16.mxu1 %v4665_v1  ;;  %v1866_v4 = vrot.slane %v4939_v14, %v1865_v2 }
 0x5a6   :  { %v1823_v61 = vadd.f32 %v1821_v59, %v4929_v10  ;;  %4668 = vmatpush3.bf16.msra.mxu1 %v4665_v1 }
 0x5a7   :  { %v1822_v62 = vadd.f32 %v1820_v60, %v4925_v8  ;;  %v42_v8 = vld [vmem:[%s5552_s2 + $0x8] sm:$0xff]  ;;  %4512 = vmatprep.subr.mxu1 %v4844_v17  ;;  %v1952_v60 = vsub.s32 5, %v4933_v12 }
 0x5a8   :  { %v1827_v63 = vsel %vm61_vm0, %v1823_v61, 0.0  ;;  %v4645_v21 = vpack.c.bf16 %v44_v20, %v42_v8 }
 0x5a9   :  { %1828 = vadd.xlane.f32.xlu1 %v1827_v63  ;;  %v1824_v3 = vsel %vm61_vm0, %v1822_v62, 0.0 }
 0x5aa   :  { %1825 = vadd.xlane.f32.xlu0 %v1824_v3  ;;  %4646 = vmatprep.subr.bf16.mxu0 %v4645_v21 }
 0x5ab   :  { %4648 = vmatpush3.bf16.msra.mxu0 %v4645_v21 }
 0x5ac   :  { %4650 = vmatprep.subr.bf16.mxu0 %v4649_v24 }
 0x5af   :  { %4652 = vmatpush3.bf16.msra.mxu0 %v4649_v24  ;;  %v5220_v24 = vld [vmem:[%s5552_s2 + $0x40] sm:$0xff] }
 0x5b0   :  { %v4669_v28 = vpack.c.bf16 %v5225_v27, %v5220_v24 }
 0x5b2   :  { %4670 = vmatprep.subr.bf16.mxu0 %v4669_v28 }
 0x636   :  { %v1829_v5 = vpop.xlane.xlu1 %1828 }
 0x637   :  { %v1832_v6 = vmul.f32 0.03125, %v1829_v5  ;;  %v1826_v7 = vpop.xlane.xlu0 %1825 }
 0x638   :  { %v1831_v9 = vmul.f32 0.03125, %v1826_v7 }
 0x639   :  { %v1834_v11 = vsub.f32 %v1823_v61, %v1832_v6  ;;  %v1953_v61 = vrot.slane %v4939_v14, %v1952_v60 }
 0x63a   :  { %v1833_v15 = vsub.f32 %v1822_v62, %v1831_v9 }
 0x63b   :  { %v1836_v19 = vmul.f32 %v1834_v11, %v1834_v11 }
 0x63c   :  { %v1835_v16 = vmul.f32 %v1833_v15, %v1833_v15 }
 0x63d   :  { %v1840_v10 = vsel %vm61_vm0, %v1836_v19, 0.0 }
 0x63e   :  { %v1837_v18 = vsel %vm61_vm0, %v1835_v16, 0.0 }
 0x63f   :  { %1838 = vadd.xlane.f32.xlu0 %v1837_v18 }
 0x643   :  { %1841 = vadd.xlane.f32.xlu0 %v1840_v10 }
 0x6cc   :  { %v1839_v36 = vpop.xlane.xlu0 %1838 }
 0x6cd   :  { %v1843_v37 = vmul.f32 0.03125, %v1839_v36 }
 0x6cf   :  { %v1845_v38 = vadd.f32 1e-05, %v1843_v37 }
 0x6d0   :  { %v1842_v39 = vpop.xlane.xlu0 %1841 }
 0x6d1   :  { %4745 = vrsqrt.f32 %v1845_v38  ;;  %v1844_v40 = vmul.f32 0.03125, %v1842_v39  ;;  %v2066_v38 = vsub.s32 6, %v4933_v12  ;;  %v2072_v39 = vsub.s32 7, %v4933_v12 }
 0x6d3   :  { %v1846_v41 = vadd.f32 1e-05, %v1844_v40  ;;  %v2067_v40 = vrot.slane %v4939_v14, %v2066_v38 }
 0x6d5   :  { %4747 = vrsqrt.f32 %v1846_v41 }
 0x6db   :  { %v4746_v45 = vpop.eup %4745 }
 0x6dc   :  { %v1849_v46 = vmul.f32 %v4746_v45, %v1833_v15 }
 0x6de   :  { %v1855_v48 = vmul.f32 %v1854_v44, %v1849_v46 }
 0x6df   :  { %v4748_v49 = vpop.eup %4747 }
 0x6e0   :  { %v1850_v50 = vmul.f32 %v4748_v49, %v1834_v11  ;;  %v1861_v51 = vadd.f32 %v1860_v47, %v1855_v48 }
 0x6e2   :  { %v1856_v52 = vmul.f32 %v1854_v44, %v1850_v50  ;;  %4474 = vmatprep.mubr.msk.f32.mxu0 %vm61_vm0, %v1861_v51 }
 0x6e4   :  { %v1862_v26 = vadd.f32 %v1860_v47, %v1856_v52  ;;  %v2073_v47 = vrot.slane %v4939_v14, %v2072_v39  ;;  %v5263_v52 = vld [vmem:[%s5554_s4 + $0x8] sm:$0xff] }
 0x6e5   :  { %v2099_v14 = vrot.slane %v5263_v52, %v59_v13 }
 0x6e6   :  { %4475 = vmatmul.mubr.msk.f32.vlgmr.msra.gmra.mrb[22].mxu0 %vm61_vm0, %v1862_v26 }
 0x6e7   :  { %4672 = vmatpush3.bf16.msra.mxu0 %v4669_v28 }
 0x6e8   :  { %4674 = vmatprep.subr.bf16.mxu0 %v4673_v31 }
 0x6eb   :  { %4676 = vmatpush3.bf16.msra.mxu0 %v4673_v31 }
 0x6ec   :  { %4507 = vmatprep.subr.mxu0 %v4844_v17 }
 0x7b9   :  { %v4476_v54 = vpop.f32.mrb[22].mxu0 }
 0x7ba   :  { %v1945_v55 = vadd.f32 %v4476_v54, %v1866_v4  ;;  %v1939_v56 = vpop.f32.mrb[23].mxu0 }
 0x7bb   :  { %v1940_v57 = vadd.f32 %v1939_v56, %v1866_v4 }
 0x7bc   :  { %v1949_v59 = vmax.f32 %v1945_v55, 0.0 }
 0x7bd   :  { %v1948_v58 = vmax.f32 %v1940_v57, 0.0 }
 0x7bf   :  { %4493 = vmatprep.mubr.msk.f32.mxu1 %vm1954_vm3, %v1948_v58 }
 0x7c0   :  { %4494 = vmatmul.mubr.msk.f32.vlgmr.msra.gmra.mrb[20].mxu1 %vm1954_vm3, %v1949_v59 }
 0x7c1   :  { %4514 = vmatprep.mubr.msk.f32.mxu1 %vm4847_vm1, %v4844_v17 }
 0x893   :  { %v4495_v62 = vpop.f32.mrb[20].mxu1 }
 0x894   :  { %v2033_v63 = vadd.f32 %v4495_v62, %v1953_v61  ;;  %v2027_v3 = vpop.f32.mrb[21].mxu1 }
 0x895   :  { %v2028_v5 = vadd.f32 %v2027_v3, %v1953_v61 }
 0x896   :  { %v2037_v6 = vadd.f32 %v2033_v63, %v1862_v26 }
 0x897   :  { %v2036_v7 = vadd.f32 %v2028_v5, %v1861_v51 }
 0x898   :  { %v2041_v9 = vsel %vm61_vm0, %v2037_v6, 0.0 }
 0x899   :  { %2042 = vadd.xlane.f32.xlu0 %v2041_v9  ;;  %v2038_v11 = vsel %vm61_vm0, %v2036_v7, 0.0 }
 0x89a   :  { %2039 = vadd.xlane.f32.xlu1 %v2038_v11 }
 0x926   :  { %v2043_v15 = vpop.xlane.xlu0 %2042 }
 0x927   :  { %v2045_v16 = vmul.f32 0.03125, %v2043_v15  ;;  %v2040_v18 = vpop.xlane.xlu1 %2039 }
 0x928   :  { %v2044_v19 = vmul.f32 0.03125, %v2040_v18 }
 0x929   :  { %v2047_v10 = vsub.f32 %v2037_v6, %v2045_v16 }
 0x92a   :  { %v2046_v8 = vsub.f32 %v2036_v7, %v2044_v19 }
 0x92b   :  { %v2049_v20 = vmul.f32 %v2047_v10, %v2047_v10 }
 0x92c   :  { %v2048_v21 = vmul.f32 %v2046_v8, %v2046_v8 }
 0x92d   :  { %v2053_v22 = vsel %vm61_vm0, %v2049_v20, 0.0 }
 0x92e   :  { %2054 = vadd.xlane.f32.xlu0 %v2053_v22  ;;  %v2050_v23 = vsel %vm61_vm0, %v2048_v21, 0.0 }
 0x92f   :  { %2051 = vadd.xlane.f32.xlu1 %v2050_v23 }
 0x9bb   :  { %v2055_v32 = vpop.xlane.xlu0 %2054 }
 0x9bc   :  { %v2057_v33 = vmul.f32 0.03125, %v2055_v32  ;;  %v2052_v34 = vpop.xlane.xlu1 %2051 }
 0x9bd   :  { %v2056_v35 = vmul.f32 0.03125, %v2052_v34 }
 0x9be   :  { %v2059_v36 = vadd.f32 1e-05, %v2057_v33 }
 0x9bf   :  { %v2058_v37 = vadd.f32 1e-05, %v2056_v35 }
 0x9c0   :  { %4749 = vrsqrt.f32 %v2059_v36 }
 0x9c1   :  { %4751 = vrsqrt.f32 %v2058_v37 }
 0x9ca   :  { %v4750_v41 = vpop.eup %4749 }
 0x9cb   :  { %v4752_v44 = vpop.eup %4751  ;;  %v2063_v45 = vmul.f32 %v4750_v41, %v2047_v10 }
 0x9cc   :  { %v2062_v46 = vmul.f32 %v4752_v44, %v2046_v8 }
 0x9cd   :  { %v2069_v48 = vmul.f32 %v2067_v40, %v2063_v45 }
 0x9ce   :  { %v2068_v49 = vmul.f32 %v2067_v40, %v2062_v46 }
 0x9cf   :  { %v5252_v51 = vadd.f32 %v2073_v47, %v2069_v48 }
 0x9d0   :  { %v5250_v50 = vadd.f32 %v2073_v47, %v2068_v49 }
 0x9d2   :  { %4504 = vmatprep.mubr.msk.f32.mxu0 %vm61_vm0, %v5250_v50 }
 0x9d3   :  { %4505 = vmatmul.mubr.msk.f32.vlgmr.msra.gmra.mrb[24].mxu0 %vm61_vm0, %v5252_v51 }
 0x9d4   :  { %4509 = vmatprep.mubr.msk.f32.mxu0 %vm4847_vm1, %v4844_v17 }
 0xaa6   :  { %v4506_v26 = vpop.f32.mrb[24].mxu0 }
 0xaa7   :  { %v5268_v53 = vadd.f32 %v4506_v26, %v2099_v14  ;;  %v2172_v0 = vpop.f32.mrb[25].mxu0 }
 0xaa8   :  { %v5270_v1 = vadd.f32 %v2172_v0, %v2099_v14 }
 0xaa9   :  { %2185 = vrot.lane.b32.xlu0 %v5268_v53, %s4846_s18 }
 0xaaa   :  { %2183 = vrot.lane.b32.xlu1 %v5270_v1, %s4846_s18 }
 0xaad   :  { %2191 = vrot.lane.b32.xlu0 %v5270_v1, %s4848_s19 }
 0xaae   :  { %2187 = vrot.lane.b32.xlu1 %v5270_v1, %s4845_s17 }
 0xab1   :  { %2195 = vrot.lane.b32.xlu0 %v5270_v1, %s4849_s20 }
 0xab2   :  { %2189 = vrot.lane.b32.xlu1 %v5268_v53, %s4845_s17 }
 0xab6   :  { %2193 = vrot.lane.b32.xlu1 %v5268_v53, %s4848_s19 }
 0xaba   :  { %2271 = vrot.lane.b32.xlu1 %v5268_v53, %s4849_s20 }
 0xb1b   :  { %v5288_v13 = vpop.permute.xlu0 %2185 }
 0xb1c   :  { %2423 = vrot.lane.b32.xlu1 %v5288_v13, %s4849_s20  ;;  %v5292_v4 = vpop.permute.xlu1 %2183 }
 0xb1d   :  { %2347 = vrot.lane.b32.xlu0 %v5292_v4, %s4849_s20 }
 0xb1f   :  { %v5296_v54 = vpop.permute.xlu0 %2191 }
 0xb20   :  { %v5298_v55 = vpop.permute.xlu1 %2187 }
 0xb21   :  { %2499 = vrot.lane.b32.xlu0 %v5298_v55, %s4849_s20 }
 0xb23   :  { %v2196_v56 = vpop.permute.xlu0 %2195 }
 0xb24   :  { %4508 = vmatpush3.xpose.msk.msra.mxu0 %vm159_vm2, %v2196_v56  ;;  %v5303_v57 = vpop.permute.xlu1 %2189 }
 0xb25   :  { %2651 = vrot.lane.b32.xlu0 %v5296_v54, %s4849_s20  ;;  %2575 = vrot.lane.b32.xlu1 %v5303_v57, %s4849_s20 }
 0xb26   :  { %4517 = vmatprep.subr.mxu0 %v4844_v17 }
 0xb27   :  { %4510 = vmatmul.mubr.msk.f32.vlgmr.msra.gmra.mrb[26].mxu0 %vm159_vm2, %v5270_v1 }
 0xb28   :  { %v5312_v58 = vpop.permute.xlu1 %2193  ;;  %4519 = vmatprep.mubr.msk.f32.mxu0 %vm4847_vm1, %v4844_v17 }
 0xb29   :  { %2727 = vrot.lane.b32.xlu1 %v5312_v58, %s4849_s20 }
 0xb2c   :  { %v2272_v59 = vpop.permute.xlu1 %2271 }
 0xb2d   :  { %4513 = vmatpush3.xpose.msk.msra.mxu1 %vm159_vm2, %v2272_v59 }
 0xb2e   :  { %4522 = vmatprep.subr.mxu1 %v4844_v17 }
 0xb30   :  { %4515 = vmatmul.mubr.msk.f32.vlgmr.msra.gmra.mrb[22].mxu1 %vm159_vm2, %v5268_v53 }
 0xb31   :  { %4524 = vmatprep.mubr.msk.f32.mxu1 %vm4847_vm1, %v4844_v17 }
 0xb8e   :  { %v2424_v61 = vpop.permute.xlu1 %2423 }
 0xb8f   :  { %v2348_v62 = vpop.permute.xlu0 %2347  ;;  %4523 = vmatpush3.xpose.msk.msra.mxu1 %vm159_vm2, %v2424_v61 }
 0xb90   :  { %4518 = vmatpush3.xpose.msk.msra.mxu0 %vm159_vm2, %v2348_v62  ;;  %4532 = vmatprep.subr.mxu1 %v4844_v17 }
 0xb91   :  { %4527 = vmatprep.subr.mxu0 %v4844_v17 }
 0xb92   :  { %4525 = vmatmul.mubr.msk.f32.vlgmr.msra.gmra.mrb[24].mxu1 %vm159_vm2, %v5288_v13 }
 0xb93   :  { %4520 = vmatmul.mubr.msk.f32.vlgmr.msra.gmra.mrb[28].mxu0 %vm159_vm2, %v5292_v4  ;;  %v2500_v63 = vpop.permute.xlu0 %2499  ;;  %4534 = vmatprep.mubr.msk.f32.mxu1 %vm4847_vm1, %v4844_v17 }
 0xb94   :  { %4528 = vmatpush3.xpose.msk.msra.mxu0 %vm159_vm2, %v2500_v63  ;;  %4529 = vmatprep.mubr.msk.f32.mxu0 %vm4847_vm1, %v4844_v17 }
 0xb95   :  { %4537 = vmatprep.subr.mxu0 %v4844_v17 }
 0xb97   :  { %4530 = vmatmul.mubr.msk.f32.vlgmr.msra.gmra.mrb[30].mxu0 %vm159_vm2, %v5298_v55  ;;  %v2652_v3 = vpop.permute.xlu0 %2651  ;;  %v2576_v5 = vpop.permute.xlu1 %2575 }
 0xb98   :  { %4533 = vmatpush3.xpose.msk.msra.mxu1 %vm159_vm2, %v2576_v5  ;;  %4538 = vmatpush3.xpose.msk.msra.mxu0 %vm159_vm2, %v2652_v3 }
 0xb99   :  { %4539 = vmatprep.mubr.msk.f32.mxu0 %vm4847_vm1, %v4844_v17  ;;  %4542 = vmatprep.subr.mxu1 %v4844_v17 }
 0xb9a   :  { %4547 = vmatprep.subr.mxu0 %v4844_v17 }
 0xb9b   :  { %4535 = vmatmul.mubr.msk.f32.vlgmr.msra.gmra.mrb[26].mxu1 %vm159_vm2, %v5303_v57  ;;  %4540 = vmatmul.mubr.msk.f32.vlgmr.msra.gmra.mrb[32].mxu0 %vm159_vm2, %v5296_v54  ;;  %v2728_v6 = vpop.permute.xlu1 %2727 }
 0xb9c   :  { %4543 = vmatpush3.xpose.msk.msra.mxu1 %vm159_vm2, %v2728_v6  ;;  %4544 = vmatprep.mubr.msk.f32.mxu1 %vm4847_vm1, %v4844_v17 }
 0xb9d   :  { %4552 = vmatprep.subr.mxu1 %v4844_v17  ;;  %4549 = vmatprep.mubr.msk.f32.mxu0 %vm4847_vm1, %v4844_v17 }
 0xb9f   :  { %4545 = vmatmul.mubr.msk.f32.vlgmr.msra.gmra.mrb[28].mxu1 %vm159_vm2, %v5312_v58 }
 0xba0   :  { %4554 = vmatprep.mubr.msk.f32.mxu1 %vm4847_vm1, %v4844_v17 }
 0xbfa   :  { %v2267_v7 = vpop.f32.mrb[26].mxu0 }
 0xbfb   :  { %v4511_v9 = vpop.f32.mrb[27].mxu0  ;;  %v2803_v11 = vsel %vm159_vm2, %v2267_v7, -inf }
 0xbfc   :  { %2804 = vmax.xlane.f32.xlu0 %v2803_v11 }
 0xc03   :  { %v2343_v15 = vpop.f32.mrb[22].mxu1 }
 0xc04   :  { %v4516_v16 = vpop.f32.mrb[23].mxu1  ;;  %v2806_v18 = vsel %vm159_vm2, %v2343_v15, -inf }
 0xc05   :  { %2807 = vmax.xlane.f32.xlu1 %v2806_v18 }
 0xc65   :  { %v2495_v19 = vpop.f32.mrb[24].mxu1 }
 0xc66   :  { %v2419_v10 = vpop.f32.mrb[28].mxu0  ;;  %v4526_v8 = vpop.f32.mrb[25].mxu1  ;;  %v2812_v31 = vsel %vm159_vm2, %v2495_v19, -inf }
 0xc67   :  { %v4521_v20 = vpop.f32.mrb[29].mxu0  ;;  %v2809_v21 = vsel %vm159_vm2, %v2419_v10, -inf }
 0xc68   :  { %2810 = vmax.xlane.f32.xlu0 %v2809_v21 }
 0xc6a   :  { %v2571_v22 = vpop.f32.mrb[30].mxu0 }
 0xc6b   :  { %v4531_v23 = vpop.f32.mrb[31].mxu0  ;;  %v2815_v28 = vsel %vm159_vm2, %v2571_v22, -inf }
 0xc6c   :  { %2816 = vmax.xlane.f32.xlu1 %v2815_v28  ;;  %2813 = vmax.xlane.f32.xlu0 %v2812_v31 }
 0xc6e   :  { %v2647_v32 = vpop.f32.mrb[26].mxu1  ;;  %v2723_v33 = vpop.f32.mrb[32].mxu0 }
 0xc6f   :  { %v4536_v34 = vpop.f32.mrb[27].mxu1  ;;  %v4541_v35 = vpop.f32.mrb[33].mxu0  ;;  %v2821_v36 = vsel %vm159_vm2, %v2723_v33, -inf  ;;  %v2818_v37 = vsel %vm159_vm2, %v2647_v32, -inf }
 0xc70   :  { %2822 = vmax.xlane.f32.xlu1 %v2821_v36  ;;  %2819 = vmax.xlane.f32.xlu0 %v2818_v37 }
 0xc72   :  { %v2799_v40 = vpop.f32.mrb[28].mxu1 }
 0xc73   :  { %v4546_v41 = vpop.f32.mrb[29].mxu1  ;;  %v2824_v44 = vsel %vm159_vm2, %v2799_v40, -inf }
 0xc74   :  { %2825 = vmax.xlane.f32.xlu0 %v2824_v44 }
 0xc81   :  { %2891 = vrot.lane.b32.xlu1 %v5270_v1, %s4850_s21 }
 0xc85   :  { %3043 = vrot.lane.b32.xlu1 %v5292_v4, %s4850_s21 }
 0xc89   :  { %3119 = vrot.lane.b32.xlu1 %v5288_v13, %s4850_s21  ;;  %v2805_v47 = vpop.xlane.xlu0 %2804 }
 0xc8a   :  { %2967 = vrot.lane.b32.xlu0 %v5268_v53, %s4850_s21  ;;  %v2827_v48 = vsub.f32 %v2267_v7, %v2805_v47 }
 0xc8c   :  { %v2835_v14 = vmul.f32 1.442695, %v2827_v48 }
 0xc8d   :  { %3271 = vrot.lane.b32.xlu1 %v5303_v57, %s4850_s21 }
 0xc8e   :  { %3195 = vrot.lane.b32.xlu0 %v5298_v55, %s4850_s21 }
 0xc92   :  { %v2808_v45 = vpop.xlane.xlu1 %2807 }
 0xc93   :  { %v2828_v46 = vsub.f32 %v2343_v15, %v2808_v45 }
 0xc95   :  { %v2837_v49 = vmul.f32 1.442695, %v2828_v46 }
 0xc97   :  { %4753 = vpow2.f32 %v2837_v49 }
 0xc98   :  { %4755 = vpow2.f32 %v2835_v14 }
 0xca1   :  { %v5380_v26 = vpop.eup %4753 }
 0xca2   :  { %v2854_v0 = vsel %vm159_vm2, %v5380_v26, 0.0  ;;  %v5384_v53 = vpop.eup %4755 }
 0xca3   :  { %v2851_v1 = vsel %vm159_vm2, %v5384_v53, 0.0 }
 0xcad   :  { %2855 = vadd.xlane.f32.xlu0 %v2854_v0 }
 0xcb1   :  { %2852 = vadd.xlane.f32.xlu1 %v2851_v1 }
 0xcf5   :  { %v2811_v13 = vpop.xlane.xlu0 %2810 }
 0xcf6   :  { %v2829_v4 = vsub.f32 %v2419_v10, %v2811_v13 }
 0xcf8   :  { %v2839_v55 = vmul.f32 1.442695, %v2829_v4 }
 0xcf9   :  { %v2814_v56 = vpop.xlane.xlu0 %2813  ;;  %v2817_v57 = vpop.xlane.xlu1 %2816 }
 0xcfa   :  { %4757 = vpow2.f32 %v2839_v55  ;;  %v2830_v59 = vsub.f32 %v2495_v19, %v2814_v56  ;;  %v2831_v61 = vsub.f32 %v2571_v22, %v2817_v57 }
 0xcfc   :  { %v2841_v62 = vmul.f32 1.442695, %v2830_v59  ;;  %v2843_v63 = vmul.f32 1.442695, %v2831_v61 }
 0xcfd   :  { %v2820_v3 = vpop.xlane.xlu0 %2819  ;;  %v2823_v5 = vpop.xlane.xlu1 %2822 }
 0xcfe   :  { %4759 = vpow2.f32 %v2841_v62  ;;  %v2832_v6 = vsub.f32 %v2647_v32, %v2820_v3  ;;  %v2833_v7 = vsub.f32 %v2723_v33, %v2823_v5 }
 0xcff   :  { %4761 = vpow2.f32 %v2843_v63 }
 0xd00   :  { %v2845_v9 = vmul.f32 1.442695, %v2832_v6  ;;  %v2847_v11 = vmul.f32 1.442695, %v2833_v7 }
 0xd01   :  { %v2826_v15 = vpop.xlane.xlu0 %2825  ;;  %v2892_v16 = vpop.permute.xlu1 %2891 }
 0xd02   :  { %4763 = vpow2.f32 %v2845_v9  ;;  %v2834_v18 = vsub.f32 %v2799_v40, %v2826_v15  ;;  %4548 = vmatpush3.msra.mxu0 %v2892_v16 }
 0xd03   :  { %4765 = vpow2.f32 %v2847_v11  ;;  %4557 = vmatprep.subr.mxu0 %v4844_v17 }
 0xd04   :  { %v4758_v19 = vpop.eup %4757  ;;  %v2849_v10 = vmul.f32 1.442695, %v2834_v18 }
 0xd05   :  { %v2968_v8 = vpop.permute.xlu0 %2967  ;;  %v2857_v20 = vsel %vm159_vm2, %v4758_v19, 0.0  ;;  %v3044_v37 = vpop.permute.xlu1 %3043 }
 0xd06   :  { %4767 = vpow2.f32 %v2849_v10  ;;  %2858 = vadd.xlane.f32.xlu1 %v2857_v20  ;;  %4553 = vmatpush3.msra.mxu1 %v2968_v8 }
 0xd07   :  { %4562 = vmatprep.subr.mxu1 %v4844_v17 }
 0xd08   :  { %v4760_v21 = vpop.eup %4759 }
 0xd09   :  { %v4762_v22 = vpop.eup %4761  ;;  %v2860_v23 = vsel %vm159_vm2, %v4760_v21, 0.0  ;;  %v3120_v40 = vpop.permute.xlu1 %3119 }
 0xd0a   :  { %2861 = vadd.xlane.f32.xlu0 %v2860_v23  ;;  %v2863_v28 = vsel %vm159_vm2, %v4762_v22, 0.0  ;;  %v3196_v41 = vpop.permute.xlu0 %3195 }
 0xd0b   :  { %2864 = vadd.xlane.f32.xlu1 %v2863_v28 }
 0xd0c   :  { %v5393_v31 = vpop.eup %4763 }
 0xd0d   :  { %v5395_v32 = vpop.eup %4765  ;;  %v2866_v33 = vsel %vm159_vm2, %v5393_v31, 0.0  ;;  %v3272_v44 = vpop.permute.xlu1 %3271 }
 0xd0e   :  { %2867 = vadd.xlane.f32.xlu0 %v2866_v33  ;;  %v2869_v34 = vsel %vm159_vm2, %v5395_v32, 0.0 }
 0xd0f   :  { %2870 = vadd.xlane.f32.xlu1 %v2869_v34 }
 0xd10   :  { %v5401_v35 = vpop.eup %4767 }
 0xd11   :  { %v2872_v36 = vsel %vm159_vm2, %v5401_v35, 0.0 }
 0xd12   :  { %2873 = vadd.xlane.f32.xlu0 %v2872_v36 }
 0xd20   :  { %3423 = vrot.lane.b32.xlu1 %v5312_v58, %s4850_s21 }
 0xd24   :  { %3585 = vrot.lane.b32.xlu1 %v5225_v27, %s4851_s22 }
 0xd28   :  { %3347 = vrot.lane.b32.xlu0 %v5296_v54, %s4850_s21  ;;  %3755 = vrot.lane.b32.xlu1 %v5237_v30, %s4851_s22 }
 0xd2c   :  { %3500 = vrot.lane.b32.xlu0 %v5220_v24, %s4851_s22 }
 0xd30   :  { %3670 = vrot.lane.b32.xlu0 %v5232_v29, %s4851_s22 }
 0xd3a   :  { %v2856_v58 = vpop.xlane.xlu0 %2855 }
 0xd3b   :  { %4769 = vrcp.f32 %v2856_v58 }
 0xd3e   :  { %v2853_v45 = vpop.xlane.xlu1 %2852 }
 0xd3f   :  { %4771 = vrcp.f32 %v2853_v45 }
 0xd45   :  { %v4770_v27 = vpop.eup %4769 }
 0xd46   :  { %v2878_v54 = vmul.f32 %v4770_v27, %v5380_v26 }
 0xd48   :  { %4555 = vmatmul.mubr.msk.f32.vlgmr.msra.gmra.mrb[30].mxu1 %vm159_vm2, %v2878_v54 }
 0xd49   :  { %v4772_v30 = vpop.eup %4771  ;;  %4563 = vmatpush3.msra.mxu1 %v3120_v40  ;;  %4564 = vmatprep.mubr.msk.f32.mxu1 %vm4847_vm1, %v4844_v17 }
 0xd4a   :  { %v2876_v24 = vmul.f32 %v4772_v30, %v5384_v53  ;;  %4572 = vmatprep.subr.mxu1 %v4844_v17 }
 0xd4c   :  { %4550 = vmatmul.mubr.msk.f32.vlgmr.msra.gmra.mrb[34].mxu0 %vm159_vm2, %v2876_v24 }
 0xd4d   :  { %4558 = vmatpush3.msra.mxu0 %v3044_v37  ;;  %4559 = vmatprep.mubr.msk.f32.mxu0 %vm4847_vm1, %v4844_v17 }
 0xd4e   :  { %4567 = vmatprep.subr.mxu0 %v4844_v17 }
 0xd93   :  { %v2859_v29 = vpop.xlane.xlu1 %2858 }
 0xd94   :  { %4773 = vrcp.f32 %v2859_v29 }
 0xd97   :  { %v2862_v46 = vpop.xlane.xlu0 %2861 }
 0xd98   :  { %4775 = vrcp.f32 %v2862_v46  ;;  %v2865_v47 = vpop.xlane.xlu1 %2864 }
 0xd99   :  { %4777 = vrcp.f32 %v2865_v47 }
 0xd9b   :  { %v2868_v48 = vpop.xlane.xlu0 %2867 }
 0xd9c   :  { %4779 = vrcp.f32 %v2868_v48  ;;  %v2871_v49 = vpop.xlane.xlu1 %2870 }
 0xd9d   :  { %4781 = vrcp.f32 %v2871_v49  ;;  %v3856_v49 = vrot.slane %v5263_v52, %v1818_v25 }
 0xd9e   :  { %v4774_v14 = vpop.eup %4773 }
 0xd9f   :  { %v2880_v26 = vmul.f32 %v4774_v14, %v4758_v19  ;;  %v2874_v0 = vpop.xlane.xlu0 %2873 }
 0xda0   :  { %4783 = vrcp.f32 %v2874_v0  ;;  %v3424_v63 = vpop.permute.xlu1 %3423 }
 0xda1   :  { %4560 = vmatmul.mubr.msk.f32.vlgmr.msra.gmra.mrb[36].mxu0 %vm159_vm2, %v2880_v26 }
 0xda2   :  { %v4776_v53 = vpop.eup %4775  ;;  %4568 = vmatpush3.msra.mxu0 %v3196_v41  ;;  %4569 = vmatprep.mubr.msk.f32.mxu0 %vm4847_vm1, %v4844_v17 }
 0xda3   :  { %v4778_v1 = vpop.eup %4777  ;;  %v2882_v13 = vmul.f32 %v4776_v53, %v4760_v21  ;;  %v3348_v4 = vpop.permute.xlu0 %3347  ;;  %4577 = vmatprep.subr.mxu0 %v4844_v17 }
 0xda4   :  { %v2884_v55 = vmul.f32 %v4778_v1, %v4762_v22  ;;  %v3586_v6 = vpop.permute.xlu1 %3585 }
 0xda5   :  { %4565 = vmatmul.mubr.msk.f32.vlgmr.msra.gmra.mrb[32].mxu1 %vm159_vm2, %v2882_v13 }
 0xda6   :  { %v4780_v56 = vpop.eup %4779  ;;  %4570 = vmatmul.mubr.msk.f32.vlgmr.msra.gmra.mrb[38].mxu0 %vm159_vm2, %v2884_v55  ;;  %4573 = vmatpush3.msra.mxu1 %v3272_v44 }
 0xda7   :  { %v4782_v57 = vpop.eup %4781  ;;  %v2886_v59 = vmul.f32 %v4780_v56, %v5393_v31  ;;  %4578 = vmatpush3.msra.mxu0 %v3348_v4  ;;  %4574 = vmatprep.mubr.msk.f32.mxu1 %vm4847_vm1, %v4844_v17  ;;  %v3501_v61 = vpop.permute.xlu0 %3500 }
 0xda8   :  { %v2888_v62 = vmul.f32 %v4782_v57, %v5395_v32  ;;  %4579 = vmatprep.mubr.msk.f32.mxu0 %vm4847_vm1, %v4844_v17  ;;  %4582 = vmatprep.subr.mxu1 %v4844_v17  ;;  %v3756_v9 = vpop.permute.xlu1 %3755 }
 0xda9   :  { %4575 = vmatmul.mubr.msk.f32.vlgmr.msra.gmra.mrb[34].mxu1 %vm159_vm2, %v2886_v59  ;;  %4587 = vmatprep.subr.mxu0 %v3501_v61 }
 0xdaa   :  { %v4784_v3 = vpop.eup %4783  ;;  %4580 = vmatmul.mubr.msk.f32.vlgmr.msra.gmra.mrb[40].mxu0 %vm159_vm2, %v2888_v62  ;;  %4583 = vmatpush3.msra.mxu1 %v3424_v63 }
 0xdab   :  { %v2890_v5 = vmul.f32 %v4784_v3, %v5401_v35  ;;  %4584 = vmatprep.mubr.msk.f32.mxu1 %vm4847_vm1, %v4844_v17  ;;  %4588 = vmatpush3.msra.mxu0 %v3501_v61  ;;  %v3671_v7 = vpop.permute.xlu0 %3670 }
 0xdac   :  { %4592 = vmatprep.subr.mxu1 %v3586_v6  ;;  %4597 = vmatprep.subr.mxu0 %v3671_v7 }
 0xdad   :  { %4585 = vmatmul.mubr.msk.f32.vlgmr.msra.gmra.mrb[36].mxu1 %vm159_vm2, %v2890_v5 }
 0xdae   :  { %4593 = vmatpush3.msra.mxu1 %v3586_v6 }
 0xdaf   :  { %4602 = vmatprep.subr.mxu1 %v3756_v9 }
 0xe1b   :  { %v3039_v11 = vpop.f32.mrb[30].mxu1 }
 0xe1c   :  { %v4556_v15 = vpop.f32.mrb[31].mxu1 }
 0xe1f   :  { %v2963_v16 = vpop.f32.mrb[34].mxu0 }
 0xe20   :  { %v4551_v18 = vpop.f32.mrb[35].mxu0  ;;  %4589 = vmatprep.mubr.msk.f32.mxu0 %vm159_vm2, %v2963_v16  ;;  %v4174_v16 = vld [vmem:[%s5552_s2 + $0x68] sm:$0xff] }
 0xe21   :  { %4590 = vmatmul.mubr.msk.f32.vlgmr.msra.gmra.mrb[42].mxu0 %vm159_vm2, %v3039_v11  ;;  %v4172_v11 = vld [vmem:[%s5552_s2 + $0x58] sm:$0xff] }
 0xe22   :  { %4598 = vmatpush3.msra.mxu0 %v3671_v7  ;;  %v4176_v18 = vld [vmem:[%s5552_s2 + $0x78] sm:$0xff] }
 0xe74   :  { %v3115_v17 = vpop.f32.mrb[36].mxu0 }
 0xe75   :  { %v4561_v19 = vpop.f32.mrb[37].mxu0  ;;  %4594 = vmatprep.mubr.msk.f32.mxu1 %vm159_vm2, %v3115_v17  ;;  %v4681_v17 = vpack.c.bf16 %v4176_v18, %v4174_v16 }
 0xe76   :  { %v4177_v19 = vld [vmem:[%s5553_s3 + $0x40] sm:$0xff] }
 0xe78   :  { %v3191_v10 = vpop.f32.mrb[32].mxu1 }
 0xe79   :  { %v3267_v8 = vpop.f32.mrb[38].mxu0  ;;  %v4566_v20 = vpop.f32.mrb[33].mxu1  ;;  %4595 = vmatmul.mubr.msk.f32.vlgmr.msra.gmra.mrb[38].mxu1 %vm159_vm2, %v3191_v10  ;;  %v4178_v10 = vld [vmem:[%s5553_s3 + $0x48] sm:$0xff] }
 0xe7a   :  { %v4571_v21 = vpop.f32.mrb[39].mxu0  ;;  %4599 = vmatprep.mubr.msk.f32.mxu0 %vm159_vm2, %v3267_v8  ;;  %4603 = vmatpush3.msra.mxu1 %v3756_v9  ;;  %v4179_v8 = vld [vmem:[%s5553_s3 + $0x50] sm:$0xff]  ;;  %v4685_v20 = vpack.c.bf16 %v4178_v10, %v4177_v19  ;;  %v4102_v19 = vrot.slane %v5263_v52, %v2066_v38 }
 0xe7b   :  { %v4180_v21 = vld [vmem:[%s5553_s3 + $0x58] sm:$0xff] }
 0xe7c   :  { %v3343_v22 = vpop.f32.mrb[34].mxu1  ;;  %4686 = vmatprep.subr.bf16.mxu1 %v4685_v20 }
 0xe7d   :  { %v3419_v23 = vpop.f32.mrb[40].mxu0  ;;  %v4576_v28 = vpop.f32.mrb[35].mxu1  ;;  %4600 = vmatmul.mubr.msk.f32.vlgmr.msra.gmra.mrb[44].mxu0 %vm159_vm2, %v3343_v22  ;;  %v4689_v22 = vpack.c.bf16 %v4180_v21, %v4179_v8  ;;  %v4108_v21 = vrot.slane %v5263_v52, %v2072_v39 }
 0xe7e   :  { %v4581_v31 = vpop.f32.mrb[41].mxu0  ;;  %4604 = vmatprep.mubr.msk.f32.mxu1 %vm159_vm2, %v3419_v23  ;;  %v4181_v23 = vld [vmem:[%s5553_s3 + $0x60] sm:$0xff]  ;;  %v4182_v28 = vld [vmem:[%s5553_s3 + $0x68] sm:$0xff] }
 0xe7f   :  { %v4693_v31 = vpack.c.bf16 %v4182_v28, %v4181_v23 }
 0xe80   :  { %v3495_v32 = vpop.f32.mrb[36].mxu1 }
 0xe81   :  { %v4586_v33 = vpop.f32.mrb[37].mxu1  ;;  %4605 = vmatmul.mubr.msk.f32.vlgmr.msra.gmra.mrb[40].mxu1 %vm159_vm2, %v3495_v32 }
 0xe82   :  { %4688 = vmatpush3.bf16.msra.mxu1 %v4685_v20 }
 0xe83   :  { %4690 = vmatprep.subr.bf16.mxu1 %v4689_v22 }
 0xe86   :  { %4692 = vmatpush3.bf16.msra.mxu1 %v4689_v22 }
 0xe87   :  { %4694 = vmatprep.subr.bf16.mxu1 %v4693_v31 }
 0xe8a   :  { %4696 = vmatpush3.bf16.msra.mxu1 %v4693_v31 }
 0xef4   :  { %v4591_v34 = vpop.f32.mrb[42].mxu0 }
 0xef5   :  { %v3575_v35 = vpop.f32.mrb[43].mxu0  ;;  %v3846_v37 = vsel %vm61_vm0, %v4591_v34, 0.0 }
 0xef6   :  { %v3839_v44 = vsel %vm61_vm0, %v3575_v35, 0.0 }
 0xf4c   :  { %v4596_v36 = vpop.f32.mrb[38].mxu1 }
 0xf4d   :  { %v3847_v40 = vsel %vm61_vm0, %v4596_v36, 0.0  ;;  %v3660_v41 = vpop.f32.mrb[39].mxu1 }
 0xf4e   :  { %v3848_v58 = vadd.f32 %v3847_v40, %v3846_v37  ;;  %v3840_v45 = vsel %vm61_vm0, %v3660_v41, 0.0  ;;  %v3890_v40 = vrot.slane %v5263_v52, %v1853_v42  ;;  %v4183_v42 = vld [vmem:[%s5553_s3 + $0x70] sm:$0xff] }
 0xf4f   :  { %v3841_v27 = vadd.f32 %v3840_v45, %v3839_v44 }
 0xf50   :  { %v4601_v54 = vpop.f32.mrb[44].mxu0 }
 0xf51   :  { %v3849_v30 = vsel %vm61_vm0, %v4601_v54, 0.0  ;;  %v3745_v24 = vpop.f32.mrb[45].mxu0 }
 0xf52   :  { %v3850_v29 = vadd.f32 %v3849_v30, %v3848_v58  ;;  %v3842_v46 = vsel %vm61_vm0, %v3745_v24, 0.0  ;;  %v3896_v58 = vrot.slane %v5263_v52, %v1859_v43  ;;  %v3902_v43 = vrot.slane %v5263_v52, %v1865_v2 }
 0xf53   :  { %v3843_v47 = vadd.f32 %v3842_v46, %v3841_v27  ;;  %v4184_v46 = vld [vmem:[%s5553_s3 + $0x78] sm:$0xff]  ;;  %s4852_s3 = smov [#allocation5]  }
 0xf54   :  { %v4606_v48 = vpop.f32.mrb[40].mxu1  ;;  %s4118_s12 = sshll.u32 %s4852_s3, 4  ;;  %s4119_s12 = int_to_ptr.vmem [resolvable:$true] %s4118_s12 }
 0xf55   :  { %v3851_v14 = vsel %vm61_vm0, %v4606_v48, 0.0  ;;  %v3830_v26 = vpop.f32.mrb[41].mxu1  ;;  %s4815_s0 = scalar_lea.vmem %s4119_s12, 256  ;;  %p4820_p9 = scmp.lt.s32.totalorder %s4119_s12, %s4119_s12 }
 0xf56   :  { %v3852_v0 = vadd.f32 %v3851_v14, %v3850_v29  ;;  %v3844_v53 = vsel %vm61_vm0, %v3830_v26, 0.0  ;;  %p4816_p8 = scmp.ne.s32.totalorder %s4119_s12, %s4815_s0  ;;  %p4821_p10 = scmp.lt.s32.totalorder %s4815_s0, %s4815_s0 }
 0xf57   :  { %v3845_v1 = vadd.f32 %v3844_v53, %v3843_v47  ;;  %v4697_v47 = vpack.c.bf16 %v4184_v46, %v4183_v42 }
 0xf58   :  { %v3858_v13 = vadd.f32 %v3856_v49, %v3852_v0  ;;  %p4822_p11 = por %p4821_p10, %p4820_p9 }
 0xf59   :  { %v3857_v4 = vadd.f32 %v3856_v49, %v3845_v1  ;;  %4698 = vmatprep.subr.bf16.mxu1 %v4697_v47  ;;  %v3989_v1 = vrot.slane %v5263_v52, %v1952_v60 }
 0xf5a   :  { %v3860_v55 = vadd.f32 %v3858_v13, %v5252_v51  ;;  %4700 = vmatpush3.bf16.msra.mxu1 %v4697_v47  ;;  %p4823_p12 = pnand %p4822_p11, %p4816_p8 }
 0xf5b   :  { %v3859_v56 = vadd.f32 %v3857_v4, %v5250_v50  ;;  %v4170_v50 = vld [vmem:[%s5552_s2 + $0x48] sm:$0xff] }
 0xf5c   :  { %v3864_v57 = vsel %vm61_vm0, %v3860_v55, 0.0  ;;  %v4677_v15 = vpack.c.bf16 %v4172_v11, %v4170_v50 }
 0xf5d   :  { %3865 = vadd.xlane.f32.xlu1 %v3864_v57  ;;  %v3861_v59 = vsel %vm61_vm0, %v3859_v56, 0.0 }
 0xf5e   :  { %3862 = vadd.xlane.f32.xlu0 %v3861_v59  ;;  %4678 = vmatprep.subr.bf16.mxu0 %v4677_v15 }
 0xf5f   :  { %4680 = vmatpush3.bf16.msra.mxu0 %v4677_v15 }
 0xf60   :  { %4682 = vmatprep.subr.bf16.mxu0 %v4681_v17 }
 0xf63   :  { %4684 = vmatpush3.bf16.msra.mxu0 %v4681_v17 }
 0xfea   :  { %v3866_v25 = vpop.xlane.xlu1 %3865 }
 0xfeb   :  { %v3868_v61 = vmul.f32 0.03125, %v3866_v25  ;;  %v3863_v62 = vpop.xlane.xlu0 %3862 }
 0xfec   :  { %v3867_v63 = vmul.f32 0.03125, %v3863_v62 }
 0xfed   :  { %v3870_v3 = vsub.f32 %v3860_v55, %v3868_v61 }
 0xfee   :  { %v3869_v5 = vsub.f32 %v3859_v56, %v3867_v63 }
 0xfef   :  { %v3872_v9 = vmul.f32 %v3870_v3, %v3870_v3 }
 0xff0   :  { %v3871_v6 = vmul.f32 %v3869_v5, %v3869_v5 }
 0xff1   :  { %v3876_v51 = vsel %vm61_vm0, %v3872_v9, 0.0 }
 0xff2   :  { %v3873_v7 = vsel %vm61_vm0, %v3871_v6, 0.0 }
 0xff3   :  { %3874 = vadd.xlane.f32.xlu0 %v3873_v7 }
 0xff7   :  { %3877 = vadd.xlane.f32.xlu0 %v3876_v51 }
0x1080   :  { %v3875_v32 = vpop.xlane.xlu0 %3874 }
0x1081   :  { %v3879_v33 = vmul.f32 0.03125, %v3875_v32 }
0x1083   :  { %v3881_v34 = vadd.f32 1e-05, %v3879_v33 }
0x1084   :  { %v3878_v35 = vpop.xlane.xlu0 %3877 }
0x1085   :  { %4785 = vrsqrt.f32 %v3881_v34  ;;  %v3880_v36 = vmul.f32 0.03125, %v3878_v35 }
0x1087   :  { %v3882_v37 = vadd.f32 1e-05, %v3880_v36 }
0x1089   :  { %4787 = vrsqrt.f32 %v3882_v37 }
0x108f   :  { %v4786_v41 = vpop.eup %4785 }
0x1090   :  { %v3885_v44 = vmul.f32 %v4786_v41, %v3869_v5 }
0x1092   :  { %v3891_v45 = vmul.f32 %v3890_v40, %v3885_v44 }
0x1093   :  { %v4788_v27 = vpop.eup %4787 }
0x1094   :  { %v3886_v54 = vmul.f32 %v4788_v27, %v3870_v3  ;;  %v3897_v30 = vadd.f32 %v3896_v58, %v3891_v45 }
0x1096   :  { %v3892_v24 = vmul.f32 %v3890_v40, %v3886_v54  ;;  %4615 = vmatprep.mubr.msk.f32.mxu0 %vm61_vm0, %v3897_v30 }
0x1098   :  { %v3898_v29 = vadd.f32 %v3896_v58, %v3892_v24 }
0x109a   :  { %4616 = vmatmul.mubr.msk.f32.vlgmr.msra.gmra.mrb[46].mxu0 %vm61_vm0, %v3898_v29 }
0x116d   :  { %v4617_v48 = vpop.f32.mrb[46].mxu0 }
0x116e   :  { %v3981_v49 = vadd.f32 %v4617_v48, %v3902_v43  ;;  %v3975_v14 = vpop.f32.mrb[47].mxu0 }
0x116f   :  { %v3976_v26 = vadd.f32 %v3975_v14, %v3902_v43 }
0x1170   :  { %v3985_v53 = vmax.f32 %v3981_v49, 0.0 }
0x1171   :  { %v3984_v0 = vmax.f32 %v3976_v26, 0.0 }
0x1173   :  { %4634 = vmatprep.mubr.msk.f32.mxu1 %vm1954_vm3, %v3984_v0 }
0x1174   :  { %4635 = vmatmul.mubr.msk.f32.vlgmr.msra.gmra.mrb[42].mxu1 %vm1954_vm3, %v3985_v53 }
0x1247   :  { %v4636_v13 = vpop.f32.mrb[42].mxu1 }
0x1248   :  { %v4068_v4 = vadd.f32 %v4636_v13, %v3989_v1  ;;  %v4062_v55 = vpop.f32.mrb[43].mxu1 }
0x1249   :  { %v4063_v56 = vadd.f32 %v4062_v55, %v3989_v1 }
0x124a   :  { %v4072_v57 = vadd.f32 %v4068_v4, %v3898_v29 }
0x124b   :  { %v4071_v2 = vadd.f32 %v4063_v56, %v3897_v30 }
0x124c   :  { %v4076_v59 = vsel %vm61_vm0, %v4072_v57, 0.0 }
0x124d   :  { %4077 = vadd.xlane.f32.xlu0 %v4076_v59  ;;  %v4073_v25 = vsel %vm61_vm0, %v4071_v2, 0.0 }
0x124e   :  { %4074 = vadd.xlane.f32.xlu1 %v4073_v25 }
0x12da   :  { %v4078_v61 = vpop.xlane.xlu0 %4077 }
0x12db   :  { %v4080_v62 = vmul.f32 0.03125, %v4078_v61  ;;  %v4075_v63 = vpop.xlane.xlu1 %4074 }
0x12dc   :  { %v4079_v3 = vmul.f32 0.03125, %v4075_v63 }
0x12dd   :  { %v4082_v5 = vsub.f32 %v4072_v57, %v4080_v62 }
0x12de   :  { %v4081_v6 = vsub.f32 %v4071_v2, %v4079_v3 }
0x12df   :  { %v4084_v7 = vmul.f32 %v4082_v5, %v4082_v5 }
0x12e0   :  { %v4083_v60 = vmul.f32 %v4081_v6, %v4081_v6 }
0x12e1   :  { %v4088_v9 = vsel %vm61_vm0, %v4084_v7, 0.0 }
0x12e2   :  { %4089 = vadd.xlane.f32.xlu0 %v4088_v9  ;;  %v4085_v51 = vsel %vm61_vm0, %v4083_v60, 0.0 }
0x12e3   :  { %4086 = vadd.xlane.f32.xlu1 %v4085_v51 }
0x136f   :  { %v4090_v50 = vpop.xlane.xlu0 %4089 }
0x1370   :  { %v4092_v11 = vmul.f32 0.03125, %v4090_v50  ;;  %v4087_v15 = vpop.xlane.xlu1 %4086 }
0x1371   :  { %v4091_v16 = vmul.f32 0.03125, %v4087_v15 }
0x1372   :  { %v4094_v18 = vadd.f32 1e-05, %v4092_v11 }
0x1373   :  { %v4093_v17 = vadd.f32 1e-05, %v4091_v16 }
0x1374   :  { %4789 = vrsqrt.f32 %v4094_v18 }
0x1375   :  { %4791 = vrsqrt.f32 %v4093_v17 }
0x137e   :  { %v4790_v10 = vpop.eup %4789 }
0x137f   :  { %v4792_v8 = vpop.eup %4791  ;;  %v4098_v20 = vmul.f32 %v4790_v10, %v4082_v5 }
0x1380   :  { %v4097_v22 = vmul.f32 %v4792_v8, %v4081_v6 }
0x1381   :  { %v4104_v23 = vmul.f32 %v4102_v19, %v4098_v20 }
0x1382   :  { %v4103_v28 = vmul.f32 %v4102_v19, %v4097_v22 }
0x1383   :  { %v4110_v31 = vadd.f32 %v4108_v21, %v4104_v23 }
0x1384   :  { %v4109_v32 = vadd.f32 %v4108_v21, %v4103_v28 }
0x1385   :  { %4112 = vst.msk [vmem:[#allocation5 + $0x8] sm:$0xff] %vm61_vm0, %v4110_v31 }
0x1386   :  { %4111 = vst.msk [vmem:[#allocation5] sm:$0xff] %vm61_vm0, %v4109_v32 }
0x1387   :  { %4826 = shalt.err (!%p4823_p12)
}
0x1388   :  { %s4827_s17 = scalar_lea.hbm %s5555_s5, 256 }
0x1389   :  { %p4828_p13 = scmp.ne.s32.totalorder %s5555_s5, %s4827_s17  ;;  %p4831_p0 = scmp.lt.u32.totalorder %s4827_s17, %s5555_s5 }
0x138b   :  { %p4833_p1 = pnand %p4831_p0, %p4828_p13 }
0x138d   :  { %4836 = shalt.err (!%p4833_p1)
}
0x138e   :  { %4124 = dma.vmem_to_hbm [thread:$0]  %s4119_s12, 256, %s5555_s5, [#allocation4], %s4842_s28, %s4842_s28, %s4843_s29  }
0x138f   :  { %4839 = dma.done.wait [#allocation4], 256  }
0x1390   :  { %4840 = vsyncadd [#allocation4], 4294967040 }
0x1391   :  { %4128 = vsyncpa [#allocation3], 1 }
0x1392   :  { %4129 = vsyncpa [#allocation4], 1 }

</bundles_post_ra>
